<compile_context>
chip_gen: v5e
topology: v5e:2x2
jax: 0.10.0
libtpu: 0.0.40
codegen_flags: <defaults>
</compile_context>

<pallas_src>
import jax
import jax.numpy as jnp
from jax import lax
from jax.experimental import pallas as pl
from jax.experimental.pallas import tpu as pltpu


# ----------------------- trace-time weight re-packing ----------------------- #

def _shift0(w, offset, size):
    """out[a] = w[a - offset] if 0 <= a - offset < w.shape[0] else 0; out has `size` rows."""
    padded = jnp.pad(w, ((size, size),) + ((0, 0),) * (w.ndim - 1))
    return lax.dynamic_slice_in_dim(padded, size - offset, size, axis=0)


def _shift(w, offset, size, axis):
    return jnp.moveaxis(_shift0(jnp.moveaxis(w, axis, 0), offset, size), 0, axis)


def _pack_conv1_weight(w1):
    """w1 (C1, Cin, 4, 4) OIHW -> (4 shifts, 16*Cin, 4*C1) for fused conv1+pool matmuls.

    Output-channel block q = rp*2 + wp is the conv result at pool-window position (rp, wp);
    shift block index 2*r + s selects the (r, s) space-to-depth-by-4 neighbour pixel.
    """
    C1, Cin, _, _ = w1.shape
    wt = jnp.transpose(w1, (2, 3, 1, 0))                      # (i, j, c, o)
    shift_blocks = []
    for r in (0, 1):
        for s in (0, 1):
            qcols = []
            for rp in (0, 1):
                for wp in (0, 1):
                    blk = _shift(wt, 2 * rp - 4 * r, 4, 0)    # row parity a = i + 2rp - 4r
                    blk = _shift(blk, 2 * wp - 4 * s, 4, 1)   # col parity b = j + 2wp - 4s
                    qcols.append(blk.reshape(4 * 4 * Cin, C1))
            shift_blocks.append(jnp.concatenate(qcols, axis=1))
    return jnp.stack(shift_blocks, axis=0)                    # (4, 16*Cin, 4*C1)


def _pack_conv2_weight(w2):
    """w2 (C2, C1, 3, 3) OIHW -> (16*C1, 4*C2) for the fused conv2+pool single matmul."""
    C2, C1, _, _ = w2.shape
    wt = jnp.transpose(w2, (2, 3, 1, 0))                      # (i, j, c, o)
    qcols = []
    for rp in (0, 1):
        for wp in (0, 1):
            blk = _shift(wt, rp, 4, 0)                        # a = i + rp
            blk = _shift(blk, wp, 4, 1)                       # b = j + wp
            qcols.append(blk.reshape(4 * 4 * C1, C2))
    return jnp.concatenate(qcols, axis=1)                     # (256, 4*C2)


def _pick_tile(dim, target, quantum):
    """Largest tile <= target that is a multiple of `quantum` and divides `dim`."""
    t = (min(dim, target) // quantum) * quantum
    while t >= quantum:
        if dim % t == 0:
            return t
        t -= quantum
    return dim


def _tpu_params(semantics):
    return pltpu.CompilerParams(dimension_semantics=semantics,
                                vmem_limit_bytes=48 * 1024 * 1024)


# ----------------------------- Pallas kernels ------------------------------ #

def _make_conv1_pool_kernel(W4, M1, C1):
    """Fused conv1 + bias + ReLU + 2x2/2 maxpool for one image (space-to-depth-4 input)."""
    def kernel(x_ref, w_ref, b_ref, o_ref):
        acc = jnp.zeros((M1, 4 * C1), jnp.float32)
        for r in (0, 1):                       # 2x2 neighbourhood of s2d-4 pixels
            for s in (0, 1):
                off = r * W4 + s               # static shift in the flattened (row*W4+col) axis
                acc = acc + jnp.dot(x_ref[0, off:off + M1, :], w_ref[2 * r + s],
                                    preferred_element_type=jnp.float32)
        acc = jnp.maximum(acc + b_ref[...], 0.0)                 # bias + ReLU
        pooled = jnp.maximum(jnp.maximum(acc[:, 0:C1], acc[:, C1:2 * C1]),
                             jnp.maximum(acc[:, 2 * C1:3 * C1], acc[:, 3 * C1:4 * C1]))
        o_ref[0] = pooled.astype(o_ref.dtype)
    return kernel


def _make_conv2_pool_kernel(C2):
    """Fused conv2 + bias + ReLU + 2x2/stride-4 maxpool for one image (s2d-4 padded input)."""
    def kernel(z_ref, w_ref, b_ref, o_ref):
        acc = jnp.dot(z_ref[0], w_ref[...], preferred_element_type=jnp.float32)
        acc = jnp.maximum(acc + b_ref[...], 0.0)
        pooled = jnp.maximum(jnp.maximum(acc[:, 0:C2], acc[:, C2:2 * C2]),
                             jnp.maximum(acc[:, 2 * C2:3 * C2], acc[:, 3 * C2:4 * C2]))
        o_ref[0] = pooled.astype(o_ref.dtype)
    return kernel


def _fc_kernel(x_ref, w_ref, b_ref, o_ref, acc_ref):
    """Linear + ReLU, K-tiled with fp32 VMEM accumulator (reduction axis is grid axis 1)."""
    k = pl.program_id(1)

    @pl.when(k == 0)
    def _():
        acc_ref[...] = jnp.zeros_like(acc_ref)

    acc_ref[...] += jnp.dot(x_ref[...], w_ref[...], preferred_element_type=jnp.float32)

    @pl.when(k == pl.num_programs(1) - 1)
    def _():
        o_ref[...] = jnp.maximum(acc_ref[...] + b_ref[...], 0.0).astype(o_ref.dtype)


# --------------------------- model forward pass ----------------------------- #

def image_embedding_cnn_forward(x_nchw, params):
    """Pallas implementation of ImageEmbeddingCNN.forward. Input NCHW float32."""
    N, Cin, H, W = x_nchw.shape
    C1, C2 = params["w1"].shape[0], params["w2"].shape[0]
    E = params["wfc"].shape[0]
    assert H % 4 == 0 and W % 4 == 0
    H4, W4 = H // 4, W // 4

    OH1, OW1 = (H - 4) // 2 + 1, (W - 4) // 2 + 1       # conv1 output
    PH1, PW1 = (OH1 - 2) // 2 + 1, (OW1 - 2) // 2 + 1   # after maxpool(2,2)
    PH2, PW2 = (PH1 - 2) // 4 + 1, (PW1 - 2) // 4 + 1   # after conv2(pad1) + maxpool(2,s=4)
    assert H4 >= PH1 + 1 and W4 >= PW1 + 1
    assert params["wfc"].shape[1] == C2 * PH2 * PW2, "fc in_features inconsistent with input size"

    # ---- layout prep (XLA glue): NCHW -> NHWC, space-to-depth by 4, bf16 cast ---- #
    # TODO(synk): overlapping conv windows cannot be expressed by BlockSpec, so patch
    # extraction is replaced by this 1x space-to-depth relayout (no im2col inflation).
    x = jnp.transpose(x_nchw, (0, 2, 3, 1)).astype(jnp.bfloat16)
    x4 = x.reshape(N, H4, 4, W4, 4, Cin).transpose(0, 1, 3, 2, 4, 5)
    C4 = 16 * Cin
    FLAT1 = H4 * W4
    x4f = jnp.pad(x4.reshape(N, FLAT1, C4), ((0, 0), (0, 8), (0, 0)))   # slack for shifted reads
    FLAT1P = FLAT1 + 8
    M1 = PH1 * W4   # kernel computes a full W4 columns per pooled row; cols >= PW1 are dropped

    w1big = _pack_conv1_weight(params["w1"]).astype(jnp.bfloat16)       # (4, C4, 4*C1)
    b1big = jnp.tile(params["b1"], 4).reshape(1, 4 * C1).astype(jnp.float32)

    conv1_out = pl.pallas_call(
        _make_conv1_pool_kernel(W4, M1, C1),
        out_shape=jax.ShapeDtypeStruct((N, M1, C1), jnp.bfloat16),
        grid=(N,),
        in_specs=[
            pl.BlockSpec((1, FLAT1P, C4), lambda n: (n, 0, 0)),
            pl.BlockSpec((4, C4, 4 * C1), lambda n: (0, 0, 0)),
            pl.BlockSpec((1, 4 * C1), lambda n: (0, 0)),
        ],
        out_specs=pl.BlockSpec((1, M1, C1), lambda n: (n, 0, 0)),
        compiler_params=_tpu_params(("parallel",)),
        cost_estimate=pl.CostEstimate(
            flops=2 * N * M1 * (4 * C4) * (4 * C1), transcendentals=0,
            bytes_accessed=2 * N * FLAT1P * C4 + 2 * 4 * C4 * 4 * C1 + 2 * N * M1 * C1),
    )(x4f, w1big, b1big)

    y1 = conv1_out.reshape(N, PH1, W4, C1)[:, :, :PW1, :]               # (N, PH1, PW1, C1) NHWC

    # ---- conv2 input: pad 1 (conv padding), crop to 4*PH2 x 4*PW2, space-to-depth by 4 ---- #
    ypad = jnp.pad(y1, ((0, 0), (1, 1), (1, 1), (0, 0)))[:, :4 * PH2, :4 * PW2, :]
    z = ypad.reshape(N, PH2, 4, PW2, 4, C1).transpose(0, 1, 3, 2, 4, 5)
    M2 = PH2 * PW2
    z = z.reshape(N, M2, 16 * C1)

    w2big = _pack_conv2_weight(params["w2"]).astype(jnp.bfloat16)       # (16*C1, 4*C2)
    b2big = jnp.tile(params["b2"], 4).reshape(1, 4 * C2).astype(jnp.float32)

    conv2_out = pl.pallas_call(
        _make_conv2_pool_kernel(C2),
        out_shape=jax.ShapeDtypeStruct((N, M2, C2), jnp.bfloat16),
        grid=(N,),
        in_specs=[
            pl.BlockSpec((1, M2, 16 * C1), lambda n: (n, 0, 0)),
            pl.BlockSpec((16 * C1, 4 * C2), lambda n: (0, 0)),
            pl.BlockSpec((1, 4 * C2), lambda n: (0, 0)),
        ],
        out_specs=pl.BlockSpec((1, M2, C2), lambda n: (n, 0, 0)),
        compiler_params=_tpu_params(("parallel",)),
        cost_estimate=pl.CostEstimate(
            flops=2 * N * M2 * (16 * C1) * (4 * C2), transcendentals=0,
            bytes_accessed=2 * N * M2 * 16 * C1 + 2 * 16 * C1 * 4 * C2 + 2 * N * M2 * C2),
    )(z, w2big, b2big)

    # ---- Linear + ReLU: fold the NCHW flatten order into the weight at trace time ---- #
    feat = conv2_out.reshape(N, M2 * C2)                                # NHWC flatten order
    wk = params["wfc"].reshape(E, C2, PH2, PW2).transpose(0, 2, 3, 1).reshape(E, M2 * C2).T
    wk = wk.astype(jnp.bfloat16)
    bfc = params["bfc"].reshape(1, E).astype(jnp.float32)
    K_fc = M2 * C2
    TK = _pick_tile(K_fc, max(256, K_fc // 8), 128)
    TN = _pick_tile(E, 256, 128)

    emb = pl.pallas_call(
        _fc_kernel,
        out_shape=jax.ShapeDtypeStruct((N, E), jnp.float32),
        grid=(E // TN, K_fc // TK),
        in_specs=[
            pl.BlockSpec((N, TK), lambda j, k: (0, k)),
            pl.BlockSpec((TK, TN), lambda j, k: (k, j)),
            pl.BlockSpec((1, TN), lambda j, k: (0, j)),
        ],
        out_specs=pl.BlockSpec((N, TN), lambda j, k: (0, j)),
        scratch_shapes=[pltpu.VMEM((N, TN), jnp.float32)],
        compiler_params=_tpu_params(("parallel", "arbitrary")),
        cost_estimate=pl.CostEstimate(
            flops=2 * N * K_fc * E, transcendentals=0,
            bytes_accessed=2 * N * K_fc + 2 * K_fc * E + 4 * N * E),
    )(feat, wk, bfc)
    return emb


# --------------------------- pure-JAX reference ----------------------------- #

def reference_forward(x_nchw, params):
    dn = ("NCHW", "OIHW", "NCHW")
    y = lax.conv_general_dilated(x_nchw, params["w1"], (2, 2), "VALID",
                                 dimension_numbers=dn)
    y = jax.nn.relu(y + params["b1"][None, :, None, None])
    y = lax.reduce_window(y, -jnp.inf, lax.max, (1, 1, 2, 2), (1, 1, 2, 2), "VALID")
    y = lax.conv_general_dilated(y, params["w2"], (1, 1), ((1, 1), (1, 1)),
                                 dimension_numbers=dn)
    y = jax.nn.relu(y + params["b2"][None, :, None, None])
    y = lax.reduce_window(y, -jnp.inf, lax.max, (1, 1, 2, 2), (1, 1, 4, 4), "VALID")
    feat = y.reshape(y.shape[0], -1)
    return jax.nn.relu(feat @ params["wfc"].T + params["bfc"])


# ---------------------------------- main ------------------------------------ #

if __name__ == "__main__":
    key = jax.random.PRNGKey(0)
    kx, k1, k2, k3, k4, k5, k6 = jax.random.split(key, 7)

    batch, cin, hw = 2, 3, 64
    embedding_size = 512
    # derived flatten size for 64x64 input: 32*4*4 (would be 32*30*30 at 480x480)
    oh1 = (hw - 4) // 2 + 1
    ph1 = (oh1 - 2) // 2 + 1
    ph2 = (ph1 - 2) // 4 + 1
    fc_in = 32 * ph2 * ph2

    params = {
        "w1": 0.05 * jax.random.normal(k1, (16, cin, 4, 4), jnp.float32),   # OIHW
        "b1": 0.05 * jax.random.normal(k2, (16,), jnp.float32),
        "w2": 0.05 * jax.random.normal(k3, (32, 16, 3, 3), jnp.float32),    # OIHW
        "b2": 0.05 * jax.random.normal(k4, (32,), jnp.float32),
        "wfc": 0.05 * jax.random.normal(k5, (embedding_size, fc_in), jnp.float32),  # (out, in)
        "bfc": 0.05 * jax.random.normal(k6, (embedding_size,), jnp.float32),
    }

    x = jax.random.normal(kx, (batch, cin, hw, hw), jnp.float32)  # NCHW like PyTorch

    emb = jax.block_until_ready(jax.jit(image_embedding_cnn_forward)(x, params))
    assert emb.shape == (batch, embedding_size)

    ref = jax.block_until_ready(reference_forward(x, params))
    max_err = float(jnp.max(jnp.abs(emb - ref)))
    # bf16 matmul operands (fp32 accumulate) -> loose tolerance vs f32 reference
    assert jnp.allclose(emb, ref, atol=5e-2, rtol=5e-2), f"mismatch vs reference (max|diff|={max_err})"

    print("KERNEL_OK")
</pallas_src>

<mosaic_0001>
module attributes {stable_mosaic.version = 11 : i64} {
  func.func @kernel(%arg0: i32, %arg1: memref<1x264x48xbf16, #tpu.memory_space<vmem>>, %arg2: memref<4x48x64xbf16, #tpu.memory_space<vmem>>, %arg3: memref<1x64xf32, #tpu.memory_space<vmem>>, %arg4: memref<1x240x16xbf16, #tpu.memory_space<vmem>>) attributes {dimension_semantics = [#tpu.dimension_semantics<parallel>], iteration_bounds = array<i64: 2>, scalar_prefetch = 0 : i64, scratch_operands = 0 : i64, tpu.core_type = #tpu.core_type<tc>, window_params = [{transform_indices = @transform_0, window_bounds = array<i64: 1, 264, 48>}, {pipeline_mode = #tpu.pipeline_mode<synchronous>, transform_indices = @transform_1, window_bounds = array<i64: 4, 48, 64>}, {pipeline_mode = #tpu.pipeline_mode<synchronous>, transform_indices = @transform_2, window_bounds = array<i64: 1, 64>}, {transform_indices = @transform_3, window_bounds = array<i64: 1, 240, 16>}]} {
    %cst = arith.constant 0.000000e+00 : f32
    %0 = vector.broadcast %cst : f32 to vector<240x64xf32>
    %c0 = arith.constant 0 : index
    %c0_0 = arith.constant 0 : index
    %c0_1 = arith.constant 0 : index
    %1 = vector.load %arg1[%c0, %c0_0, %c0_1] : memref<1x264x48xbf16, #tpu.memory_space<vmem>>, vector<1x240x48xbf16>
    %2 = vector.shape_cast %1 : vector<1x240x48xbf16> to vector<240x48xbf16>
    %c0_2 = arith.constant 0 : index
    %c0_3 = arith.constant 0 : index
    %c0_4 = arith.constant 0 : index
    %3 = vector.load %arg2[%c0_2, %c0_3, %c0_4] : memref<4x48x64xbf16, #tpu.memory_space<vmem>>, vector<1x48x64xbf16>
    %4 = vector.shape_cast %3 : vector<1x48x64xbf16> to vector<48x64xbf16>
    %cst_5 = arith.constant dense<0.000000e+00> : vector<240x64xf32>
    %5 = tpu.matmul %2, %4, %cst_5 {dimension_numbers = #tpu.dot_dimension_numbers<[1], [0], [0], [1], [0, 0, 1, 1], [], []>} : vector<240x48xbf16>, vector<48x64xbf16>, vector<240x64xf32> -> vector<240x64xf32>
    %6 = arith.addf %0, %5 : vector<240x64xf32>
    %c0_6 = arith.constant 0 : index
    %c1 = arith.constant 1 : index
    %c0_7 = arith.constant 0 : index
    %7 = vector.load %arg1[%c0_6, %c1, %c0_7] : memref<1x264x48xbf16, #tpu.memory_space<vmem>>, vector<1x240x48xbf16>
    %8 = vector.shape_cast %7 : vector<1x240x48xbf16> to vector<240x48xbf16>
    %c1_8 = arith.constant 1 : index
    %c0_9 = arith.constant 0 : index
    %c0_10 = arith.constant 0 : index
    %9 = vector.load %arg2[%c1_8, %c0_9, %c0_10] : memref<4x48x64xbf16, #tpu.memory_space<vmem>>, vector<1x48x64xbf16>
    %10 = vector.shape_cast %9 : vector<1x48x64xbf16> to vector<48x64xbf16>
    %cst_11 = arith.constant dense<0.000000e+00> : vector<240x64xf32>
    %11 = tpu.matmul %8, %10, %cst_11 {dimension_numbers = #tpu.dot_dimension_numbers<[1], [0], [0], [1], [0, 0, 1, 1], [], []>} : vector<240x48xbf16>, vector<48x64xbf16>, vector<240x64xf32> -> vector<240x64xf32>
    %12 = arith.addf %6, %11 : vector<240x64xf32>
    %c0_12 = arith.constant 0 : index
    %c16 = arith.constant 16 : index
    %c0_13 = arith.constant 0 : index
    %13 = vector.load %arg1[%c0_12, %c16, %c0_13] : memref<1x264x48xbf16, #tpu.memory_space<vmem>>, vector<1x240x48xbf16>
    %14 = vector.shape_cast %13 : vector<1x240x48xbf16> to vector<240x48xbf16>
    %c2 = arith.constant 2 : index
    %c0_14 = arith.constant 0 : index
    %c0_15 = arith.constant 0 : index
    %15 = vector.load %arg2[%c2, %c0_14, %c0_15] : memref<4x48x64xbf16, #tpu.memory_space<vmem>>, vector<1x48x64xbf16>
    %16 = vector.shape_cast %15 : vector<1x48x64xbf16> to vector<48x64xbf16>
    %cst_16 = arith.constant dense<0.000000e+00> : vector<240x64xf32>
    %17 = tpu.matmul %14, %16, %cst_16 {dimension_numbers = #tpu.dot_dimension_numbers<[1], [0], [0], [1], [0, 0, 1, 1], [], []>} : vector<240x48xbf16>, vector<48x64xbf16>, vector<240x64xf32> -> vector<240x64xf32>
    %18 = arith.addf %12, %17 : vector<240x64xf32>
    %c0_17 = arith.constant 0 : index
    %c17 = arith.constant 17 : index
    %c0_18 = arith.constant 0 : index
    %19 = vector.load %arg1[%c0_17, %c17, %c0_18] : memref<1x264x48xbf16, #tpu.memory_space<vmem>>, vector<1x240x48xbf16>
    %20 = vector.shape_cast %19 : vector<1x240x48xbf16> to vector<240x48xbf16>
    %c3 = arith.constant 3 : index
    %c0_19 = arith.constant 0 : index
    %c0_20 = arith.constant 0 : index
    %21 = vector.load %arg2[%c3, %c0_19, %c0_20] : memref<4x48x64xbf16, #tpu.memory_space<vmem>>, vector<1x48x64xbf16>
    %22 = vector.shape_cast %21 : vector<1x48x64xbf16> to vector<48x64xbf16>
    %cst_21 = arith.constant dense<0.000000e+00> : vector<240x64xf32>
    %23 = tpu.matmul %20, %22, %cst_21 {dimension_numbers = #tpu.dot_dimension_numbers<[1], [0], [0], [1], [0, 0, 1, 1], [], []>} : vector<240x48xbf16>, vector<48x64xbf16>, vector<240x64xf32> -> vector<240x64xf32>
    %24 = arith.addf %18, %23 : vector<240x64xf32>
    %c0_22 = arith.constant 0 : index
    %c0_23 = arith.constant 0 : index
    %25 = vector.load %arg3[%c0_22, %c0_23] : memref<1x64xf32, #tpu.memory_space<vmem>>, vector<1x64xf32>
    %26 = vector.broadcast %25 : vector<1x64xf32> to vector<240x64xf32>
    %27 = arith.addf %24, %26 : vector<240x64xf32>
    %cst_24 = arith.constant 0.000000e+00 : f32
    %28 = vector.broadcast %cst_24 : f32 to vector<240x64xf32>
    %29 = arith.maximumf %27, %28 : vector<240x64xf32>
    %30 = vector.extract_strided_slice %29 {offsets = [0, 0], sizes = [240, 16], strides = [1, 1]} : vector<240x64xf32> to vector<240x16xf32>
    %31 = vector.extract_strided_slice %29 {offsets = [0, 16], sizes = [240, 16], strides = [1, 1]} : vector<240x64xf32> to vector<240x16xf32>
    %32 = arith.maximumf %30, %31 : vector<240x16xf32>
    %33 = vector.extract_strided_slice %29 {offsets = [0, 32], sizes = [240, 16], strides = [1, 1]} : vector<240x64xf32> to vector<240x16xf32>
    %34 = vector.extract_strided_slice %29 {offsets = [0, 48], sizes = [240, 16], strides = [1, 1]} : vector<240x64xf32> to vector<240x16xf32>
    %35 = arith.maximumf %33, %34 : vector<240x16xf32>
    %36 = arith.maximumf %32, %35 : vector<240x16xf32>
    %37 = arith.truncf %36 : vector<240x16xf32> to vector<240x16xbf16>
    %c0_25 = arith.constant 0 : index
    %c0_26 = arith.constant 0 : index
    %c0_27 = arith.constant 0 : index
    %38 = vector.load %arg4[%c0_25, %c0_26, %c0_27] : memref<1x240x16xbf16, #tpu.memory_space<vmem>>, vector<1x240x16xbf16>
    %39 = vector.shape_cast %38 : vector<1x240x16xbf16> to vector<240x16xbf16>
    %40 = vector.shape_cast %37 : vector<240x16xbf16> to vector<1x240x16xbf16>
    tpu.vector_store %arg4[%c0_25, %c0_26, %c0_27], %40 {strides = array<i32>} : memref<1x240x16xbf16, #tpu.memory_space<vmem>>, vector<1x240x16xbf16>,
    return
  }
  func.func @transform_0(%arg0: i32) -> (i32, i32, i32) {
    %c0_i32 = arith.constant 0 : i32
    %c0_i32_0 = arith.constant 0 : i32
    %c0_i32_1 = arith.constant 0 : i32
    return %arg0, %c0_i32, %c0_i32_0 : i32, i32, i32
  }
  func.func @transform_1(%arg0: i32) -> (i32, i32, i32) {
    %c0_i32 = arith.constant 0 : i32
    %c0_i32_0 = arith.constant 0 : i32
    %c0_i32_1 = arith.constant 0 : i32
    %c0_i32_2 = arith.constant 0 : i32
    return %c0_i32, %c0_i32_0, %c0_i32_1 : i32, i32, i32
  }
  func.func @transform_2(%arg0: i32) -> (i32, i32) {
    %c0_i32 = arith.constant 0 : i32
    %c0_i32_0 = arith.constant 0 : i32
    %c0_i32_1 = arith.constant 0 : i32
    return %c0_i32, %c0_i32_0 : i32, i32
  }
  func.func @transform_3(%arg0: i32) -> (i32, i32, i32) {
    %c0_i32 = arith.constant 0 : i32
    %c0_i32_0 = arith.constant 0 : i32
    %c0_i32_1 = arith.constant 0 : i32
    return %arg0, %c0_i32, %c0_i32_0 : i32, i32, i32
  }
}

module attributes {stable_mosaic.version = 11 : i64} {
  func.func @kernel(%arg0: i32, %arg1: memref<1x16x256xbf16, #tpu.memory_space<vmem>>, %arg2: memref<256x128xbf16, #tpu.memory_space<vmem>>, %arg3: memref<1x128xf32, #tpu.memory_space<vmem>>, %arg4: memref<1x16x32xbf16, #tpu.memory_space<vmem>>) attributes {dimension_semantics = [#tpu.dimension_semantics<parallel>], iteration_bounds = array<i64: 2>, scalar_prefetch = 0 : i64, scratch_operands = 0 : i64, tpu.core_type = #tpu.core_type<tc>, window_params = [{transform_indices = @transform_0, window_bounds = array<i64: 1, 16, 256>}, {pipeline_mode = #tpu.pipeline_mode<synchronous>, transform_indices = @transform_1, window_bounds = array<i64: 256, 128>}, {pipeline_mode = #tpu.pipeline_mode<synchronous>, transform_indices = @transform_2, window_bounds = array<i64: 1, 128>}, {transform_indices = @transform_3, window_bounds = array<i64: 1, 16, 32>}]} {
    %c0 = arith.constant 0 : index
    %c0_0 = arith.constant 0 : index
    %c0_1 = arith.constant 0 : index
    %0 = vector.load %arg1[%c0, %c0_0, %c0_1] : memref<1x16x256xbf16, #tpu.memory_space<vmem>>, vector<1x16x256xbf16>
    %1 = vector.shape_cast %0 : vector<1x16x256xbf16> to vector<16x256xbf16>
    %c0_2 = arith.constant 0 : index
    %c0_3 = arith.constant 0 : index
    %2 = vector.load %arg2[%c0_2, %c0_3] : memref<256x128xbf16, #tpu.memory_space<vmem>>, vector<256x128xbf16>
    %cst = arith.constant dense<0.000000e+00> : vector<16x128xf32>
    %3 = tpu.matmul %1, %2, %cst {dimension_numbers = #tpu.dot_dimension_numbers<[1], [0], [0], [1], [0, 0, 1, 1], [], []>} : vector<16x256xbf16>, vector<256x128xbf16>, vector<16x128xf32> -> vector<16x128xf32>
    %c0_4 = arith.constant 0 : index
    %c0_5 = arith.constant 0 : index
    %4 = vector.load %arg3[%c0_4, %c0_5] : memref<1x128xf32, #tpu.memory_space<vmem>>, vector<1x128xf32>
    %5 = vector.broadcast %4 : vector<1x128xf32> to vector<16x128xf32>
    %6 = arith.addf %3, %5 : vector<16x128xf32>
    %cst_6 = arith.constant 0.000000e+00 : f32
    %7 = vector.broadcast %cst_6 : f32 to vector<16x128xf32>
    %8 = arith.maximumf %6, %7 : vector<16x128xf32>
    %9 = vector.extract_strided_slice %8 {offsets = [0, 0], sizes = [16, 32], strides = [1, 1]} : vector<16x128xf32> to vector<16x32xf32>
    %10 = vector.extract_strided_slice %8 {offsets = [0, 32], sizes = [16, 32], strides = [1, 1]} : vector<16x128xf32> to vector<16x32xf32>
    %11 = arith.maximumf %9, %10 : vector<16x32xf32>
    %12 = vector.extract_strided_slice %8 {offsets = [0, 64], sizes = [16, 32], strides = [1, 1]} : vector<16x128xf32> to vector<16x32xf32>
    %13 = vector.extract_strided_slice %8 {offsets = [0, 96], sizes = [16, 32], strides = [1, 1]} : vector<16x128xf32> to vector<16x32xf32>
    %14 = arith.maximumf %12, %13 : vector<16x32xf32>
    %15 = arith.maximumf %11, %14 : vector<16x32xf32>
    %16 = arith.truncf %15 : vector<16x32xf32> to vector<16x32xbf16>
    %c0_7 = arith.constant 0 : index
    %c0_8 = arith.constant 0 : index
    %c0_9 = arith.constant 0 : index
    %17 = vector.load %arg4[%c0_7, %c0_8, %c0_9] : memref<1x16x32xbf16, #tpu.memory_space<vmem>>, vector<1x16x32xbf16>
    %18 = vector.shape_cast %17 : vector<1x16x32xbf16> to vector<16x32xbf16>
    %19 = vector.shape_cast %16 : vector<16x32xbf16> to vector<1x16x32xbf16>
    tpu.vector_store %arg4[%c0_7, %c0_8, %c0_9], %19 {strides = array<i32>} : memref<1x16x32xbf16, #tpu.memory_space<vmem>>, vector<1x16x32xbf16>,
    return
  }
  func.func @transform_0(%arg0: i32) -> (i32, i32, i32) {
    %c0_i32 = arith.constant 0 : i32
    %c0_i32_0 = arith.constant 0 : i32
    %c0_i32_1 = arith.constant 0 : i32
    return %arg0, %c0_i32, %c0_i32_0 : i32, i32, i32
  }
  func.func @transform_1(%arg0: i32) -> (i32, i32) {
    %c0_i32 = arith.constant 0 : i32
    %c0_i32_0 = arith.constant 0 : i32
    %c0_i32_1 = arith.constant 0 : i32
    return %c0_i32, %c0_i32_0 : i32, i32
  }
  func.func @transform_2(%arg0: i32) -> (i32, i32) {
    %c0_i32 = arith.constant 0 : i32
    %c0_i32_0 = arith.constant 0 : i32
    %c0_i32_1 = arith.constant 0 : i32
    return %c0_i32, %c0_i32_0 : i32, i32
  }
  func.func @transform_3(%arg0: i32) -> (i32, i32, i32) {
    %c0_i32 = arith.constant 0 : i32
    %c0_i32_0 = arith.constant 0 : i32
    %c0_i32_1 = arith.constant 0 : i32
    return %arg0, %c0_i32, %c0_i32_0 : i32, i32, i32
  }
}

module attributes {stable_mosaic.version = 11 : i64} {
  func.func @_fc_kernel(%arg0: i32, %arg1: i32, %arg2: memref<2x256xbf16, #tpu.memory_space<vmem>>, %arg3: memref<256x256xbf16, #tpu.memory_space<vmem>>, %arg4: memref<1x256xf32, #tpu.memory_space<vmem>>, %arg5: memref<2x256xf32, #tpu.memory_space<vmem>>, %arg6: memref<2x256xf32, #tpu.memory_space<vmem>>) attributes {dimension_semantics = [#tpu.dimension_semantics<parallel>, #tpu.dimension_semantics<arbitrary>], iteration_bounds = array<i64: 2, 2>, scalar_prefetch = 0 : i64, scratch_operands = 1 : i64, tpu.core_type = #tpu.core_type<tc>, window_params = [{transform_indices = @transform_0, window_bounds = array<i64: 2, 256>}, {transform_indices = @transform_1, window_bounds = array<i64: 256, 256>}, {transform_indices = @transform_2, window_bounds = array<i64: 1, 256>}, {transform_indices = @transform_3, window_bounds = array<i64: 2, 256>}]} {
    %c0_i32 = arith.constant 0 : i32
    %0 = arith.cmpi eq, %arg1, %c0_i32 : i32
    %1 = arith.extui %0 : i1 to i32
    %c0_i32_0 = arith.constant 0 : i32
    %2 = arith.cmpi ne, %1, %c0_i32_0 : i32
    scf.if %2 {
      %cst_9 = arith.constant 0.000000e+00 : f32
      %12 = vector.broadcast %cst_9 : f32 to vector<2x256xf32>
      %c0_10 = arith.constant 0 : index
      %c0_11 = arith.constant 0 : index
      %13 = vector.load %arg6[%c0_10, %c0_11] : memref<2x256xf32, #tpu.memory_space<vmem>>, vector<2x256xf32>
      tpu.vector_store %arg6[%c0_10, %c0_11], %12 {strides = array<i32>} : memref<2x256xf32, #tpu.memory_space<vmem>>, vector<2x256xf32>,
    } else {
    }
    %c0 = arith.constant 0 : index
    %c0_1 = arith.constant 0 : index
    %3 = vector.load %arg6[%c0, %c0_1] : memref<2x256xf32, #tpu.memory_space<vmem>>, vector<2x256xf32>
    %c0_2 = arith.constant 0 : index
    %c0_3 = arith.constant 0 : index
    %4 = vector.load %arg2[%c0_2, %c0_3] : memref<2x256xbf16, #tpu.memory_space<vmem>>, vector<2x256xbf16>
    %c0_4 = arith.constant 0 : index
    %c0_5 = arith.constant 0 : index
    %5 = vector.load %arg3[%c0_4, %c0_5] : memref<256x256xbf16, #tpu.memory_space<vmem>>, vector<256x256xbf16>
    %cst = arith.constant dense<0.000000e+00> : vector<2x256xf32>
    %6 = tpu.matmul %4, %5, %cst {dimension_numbers = #tpu.dot_dimension_numbers<[1], [0], [0], [1], [0, 0, 1, 1], [], []>} : vector<2x256xbf16>, vector<256x256xbf16>, vector<2x256xf32> -> vector<2x256xf32>
    %7 = arith.addf %3, %6 : vector<2x256xf32>
    %c0_6 = arith.constant 0 : index
    %c0_7 = arith.constant 0 : index
    %8 = vector.load %arg6[%c0_6, %c0_7] : memref<2x256xf32, #tpu.memory_space<vmem>>, vector<2x256xf32>
    tpu.vector_store %arg6[%c0_6, %c0_7], %7 {strides = array<i32>} : memref<2x256xf32, #tpu.memory_space<vmem>>, vector<2x256xf32>,
    %c1_i32 = arith.constant 1 : i32
    %9 = arith.cmpi eq, %arg1, %c1_i32 : i32
    %10 = arith.extui %9 : i1 to i32
    %c0_i32_8 = arith.constant 0 : i32
    %11 = arith.cmpi ne, %10, %c0_i32_8 : i32
    scf.if %11 {
      %c0_9 = arith.constant 0 : index
      %c0_10 = arith.constant 0 : index
      %12 = vector.load %arg6[%c0_9, %c0_10] : memref<2x256xf32, #tpu.memory_space<vmem>>, vector<2x256xf32>
      %c0_11 = arith.constant 0 : index
      %c0_12 = arith.constant 0 : index
      %13 = vector.load %arg4[%c0_11, %c0_12] : memref<1x256xf32, #tpu.memory_space<vmem>>, vector<1x256xf32>
      %14 = vector.broadcast %13 : vector<1x256xf32> to vector<2x256xf32>
      %15 = arith.addf %12, %14 : vector<2x256xf32>
      %cst_13 = arith.constant 0.000000e+00 : f32
      %16 = vector.broadcast %cst_13 : f32 to vector<2x256xf32>
      %17 = arith.maximumf %15, %16 : vector<2x256xf32>
      %c0_14 = arith.constant 0 : index
      %c0_15 = arith.constant 0 : index
      %18 = vector.load %arg5[%c0_14, %c0_15] : memref<2x256xf32, #tpu.memory_space<vmem>>, vector<2x256xf32>
      tpu.vector_store %arg5[%c0_14, %c0_15], %17 {strides = array<i32>} : memref<2x256xf32, #tpu.memory_space<vmem>>, vector<2x256xf32>,
    } else {
    }
    return
  }
  func.func @transform_0(%arg0: i32, %arg1: i32) -> (i32, i32) {
    %c0_i32 = arith.constant 0 : i32
    %c0_i32_0 = arith.constant 0 : i32
    return %c0_i32, %arg1 : i32, i32
  }
  func.func @transform_1(%arg0: i32, %arg1: i32) -> (i32, i32) {
    %c0_i32 = arith.constant 0 : i32
    return %arg1, %arg0 : i32, i32
  }
  func.func @transform_2(%arg0: i32, %arg1: i32) -> (i32, i32) {
    %c0_i32 = arith.constant 0 : i32
    %c0_i32_0 = arith.constant 0 : i32
    return %c0_i32, %arg0 : i32, i32
  }
  func.func @transform_3(%arg0: i32, %arg1: i32) -> (i32, i32) {
    %c0_i32 = arith.constant 0 : i32
    %c0_i32_0 = arith.constant 0 : i32
    return %c0_i32, %arg0 : i32, i32
  }
}

</mosaic_0001>

<bundles_post_ra>
// kernel: tile.13
= control target key start
LH: loop header
LB: loop body
LE: loop exit
PB: predicated region body
PF: predicated region fallthrough
CT: control target
= control target key end

     0   :  { %s22_s0 = inlined_call_operand.vmem [shape: f32[16], index: 0, kind: input, shape index: {}]   ;;  %s23_s1 = inlined_call_operand.vmem [shape: f32[4,16], index: 1, kind: output, shape index: {}]  }
   0x1   :  { %v4_v0 = vld [vmem:[%s22_s0] ss:$0 sm:$0xff] }
   0x2   :  { %5 = vst [vmem:[%s23_s1] sm:$0xf] %v4_v0 }

// kernel: tile.14
= control target key start
LH: loop header
LB: loop body
LE: loop exit
PB: predicated region body
PF: predicated region fallthrough
CT: control target
= control target key end

     0   :  { %s37_s8 = smov 16   ;;  %s38_s9 = smov 32   ;;  %vm7_vm0 = vcmask 130048   ;;  %vm13_vm1 = vcmask 523648   ;;  %vm19_vm2 = vcmask 392448   ;;  %vm25_vm3 = vcmask 261248   ;;  %s55_s0 = inlined_call_operand.vmem [shape: f32[4,16], index: 0, kind: input, shape index: {}]   ;;  %s56_s1 = inlined_call_operand.vmem [shape: f32[1,64], index: 1, kind: output, shape index: {}]  }
   0x1   :  { %v4_v0 = vld [vmem:[%s55_s0] sm:$0xf]  ;;  %s36_s0 = smov 48  }
   0x2   :  { %5 = vst [vmem:[#allocation1] sm:$0xf] %v4_v0 }
   0x9   :  { %v10_v1 = vld [vmem:[#allocation1 + $0x3] sm:$0x1]   ;;  %v22_v2 = vld [vmem:[#allocation1 + $0x1] sm:$0x1]   ;;  %v16_v3 = vld [vmem:[#allocation1 + $0x2] sm:$0x1]  }
   0xa   :  { %11 = vrot.lane.b32.xlu0 %v10_v1, %s36_s0  ;;  %23 = vrot.lane.b32.xlu1 %v22_v2, %s37_s8  ;;  %v6_v4 = vld [vmem:[#allocation1] sm:$0x1]  }
   0xb   :  { %8 = vst.msk [vmem:[#allocation0] sm:$0x1] %vm7_vm0, %v6_v4  }
  0x12   :  { %17 = vrot.lane.b32.xlu0 %v16_v3, %s38_s9 }
  0x7c   :  { %v12_v5 = vpop.permute.xlu0 %11   ;;  %v24_v6 = vpop.permute.xlu1 %23  }
  0x7d   :  { %14 = vst.msk [vmem:[#allocation0] sm:$0x1] %vm13_vm1, %v12_v5  }
  0x84   :  { %v18_v7 = vpop.permute.xlu0 %17  }
  0x85   :  { %20 = vst.msk [vmem:[#allocation0] sm:$0x1] %vm19_vm2, %v18_v7  }
  0x86   :  { %26 = vst.msk [vmem:[#allocation0] sm:$0x1] %vm25_vm3, %v24_v6  }
  0x8d   :  { %v29_v8 = vld [vmem:[#allocation0] sm:$0x1] }
  0x8e   :  { %32 = vst [vmem:[%s56_s1] sm:$0x1] %v29_v8 }

// kernel: tile.18
= control target key start
LH: loop header
LB: loop body
LE: loop exit
PB: predicated region body
PF: predicated region fallthrough
CT: control target
= control target key end

     0   :  { %s22_s0 = inlined_call_operand.vmem [shape: f32[32], index: 0, kind: input, shape index: {}]   ;;  %s23_s1 = inlined_call_operand.vmem [shape: f32[4,32], index: 1, kind: output, shape index: {}]  }
   0x1   :  { %v4_v0 = vld [vmem:[%s22_s0] ss:$0 sm:$0xff] }
   0x2   :  { %5 = vst [vmem:[%s23_s1] sm:$0xf] %v4_v0 }

// kernel: tile.19
= control target key start
LH: loop header
LB: loop body
LE: loop exit
PB: predicated region body
PF: predicated region fallthrough
CT: control target
= control target key end

     0   :  { %s37_s8 = smov 32   ;;  %s38_s9 = smov 64   ;;  %vm7_vm0 = vcmask 261120   ;;  %vm13_vm1 = vcmask 1048320   ;;  %vm19_vm2 = vcmask 785920   ;;  %vm25_vm3 = vcmask 523520   ;;  %s55_s0 = inlined_call_operand.vmem [shape: f32[4,32], index: 0, kind: input, shape index: {}]   ;;  %s56_s1 = inlined_call_operand.vmem [shape: f32[1,128], index: 1, kind: output, shape index: {}]  }
   0x1   :  { %v4_v0 = vld [vmem:[%s55_s0] sm:$0xf]  ;;  %s36_s0 = smov 96  }
   0x2   :  { %5 = vst [vmem:[#allocation1] sm:$0xf] %v4_v0 }
   0x9   :  { %v10_v1 = vld [vmem:[#allocation1 + $0x3] sm:$0x1]   ;;  %v22_v2 = vld [vmem:[#allocation1 + $0x1] sm:$0x1]   ;;  %v16_v3 = vld [vmem:[#allocation1 + $0x2] sm:$0x1]  }
   0xa   :  { %11 = vrot.lane.b32.xlu0 %v10_v1, %s36_s0  ;;  %23 = vrot.lane.b32.xlu1 %v22_v2, %s37_s8  ;;  %v6_v4 = vld [vmem:[#allocation1] sm:$0x1]  }
   0xb   :  { %8 = vst.msk [vmem:[#allocation0] sm:$0x1] %vm7_vm0, %v6_v4  }
  0x12   :  { %17 = vrot.lane.b32.xlu0 %v16_v3, %s38_s9 }
  0x7c   :  { %v12_v5 = vpop.permute.xlu0 %11   ;;  %v24_v6 = vpop.permute.xlu1 %23  }
  0x7d   :  { %14 = vst.msk [vmem:[#allocation0] sm:$0x1] %vm13_vm1, %v12_v5  }
  0x84   :  { %v18_v7 = vpop.permute.xlu0 %17  }
  0x85   :  { %20 = vst.msk [vmem:[#allocation0] sm:$0x1] %vm19_vm2, %v18_v7  }
  0x86   :  { %26 = vst.msk [vmem:[#allocation0] sm:$0x1] %vm25_vm3, %v24_v6  }
  0x8d   :  { %v29_v8 = vld [vmem:[#allocation0] sm:$0x1] }
  0x8e   :  { %32 = vst [vmem:[%s56_s1] sm:$0x1] %v29_v8 }

// kernel: image_embedding_cnn_forward.3
= control target key start
LH: loop header
LB: loop body
LE: loop exit
PB: predicated region body
PF: predicated region fallthrough
CT: control target
= control target key end

     0   :  { %s2450_s12 = smov 0   ;;  %s3132_s0 = inlined_call_operand.vmem [shape: bf16[2,264,48], index: 0, kind: input, shape index: {}]   ;;  %s3133_s1 = inlined_call_operand.vmem [shape: bf16[4,48,64], index: 1, kind: input, shape index: {}]   ;;  %s3134_s2 = inlined_call_operand.vmem [shape: f32[1,64], index: 2, kind: input, shape index: {}]   ;;  %s3135_s3 = inlined_call_operand.vmem [shape: bf16[2,240,16], index: 3, kind: output, shape index: {}]  }
   0x1 LB: > { %s1885_s13 = sadd.s32 4294967295, %s2426_s12   ;;  %p1889_p0 = scmp.ge.s32.totalorder %s2426_s12, 1  ;;  %s2426_s12 = sphi %s2450_s12, %s13_s12  }
   0x2   : > { %p137_p1 = scmp.lt.s32.totalorder %s2426_s12, 3 }
   0x4   : > { %p138_p2 = pnand %p1889_p0, %p137_p1 }
   0x5   : > { %p161_p3 = scmp.lt.s32.totalorder (!%p138_p2), %s1885_s13, 1  ;;  %s2428_s19 = smov (!%p138_p2), 112  }
   0x6   : > { %141 = sbr.rel (%p138_p2) target bundleno = 625 (0x271), region = 32  ;;  %s2429_s20 = smov (!%p138_p2), 96  }
   0xb   : > { %v2217_v0 = vld [vmem:[%s3133_s1 + $0x10] sm:$0xff]  ;;  %v2238_v1 = vld [vmem:[%s3133_s1 + $0x40] sm:$0xff]  ;;  %v2220_v2 = vld [vmem:[%s3133_s1 + $0x28] sm:$0xff]  ;;  %s3155_s13 = smov (!%p161_p3, %s1885_s13), 1  ;;  %vm437_vm0 = vcmask 392192   ;;  %vm1799_vm2 = vcmask 125952  }
   0xc   : > { %v2256_v3 = vld [vmem:[%s3133_s1 + $0x58] sm:$0xff]  ;;  %620 = vmatpush.bf16.msra.mxu1 %v2217_v0  ;;  %879 = vmatpush.bf16.msra.mxu2 %v2238_v1  ;;  %v2216_v4 = vld [vmem:[%s3133_s1 + $0x8] sm:$0xff]  ;;  %v2219_v6 = vld [vmem:[%s3133_s1 + $0x20] sm:$0xff]  ;;  %s2257_s30 = smul.u32 132, %s3155_s13  ;;  %vm294_vm1 = vsmask.f32 7424 }
   0xd   : > { %v2237_v5 = vld [vmem:[%s3133_s1 + $0x38] sm:$0xff]  ;;  %488 = vmatpush.bf16.msra.mxu0 %v2220_v2  ;;  %1296 = vmatpush.bf16.msra.mxu3 %v2256_v3  ;;  %v2255_v7 = vld [vmem:[%s3133_s1 + $0x50] sm:$0xff]  ;;  %v2215_v8 = vld [vmem:[%s3133_s1] sm:$0xff]  ;;  %s2258_s21 = smul.u32 120, %s3155_s13 }
   0xe   : > { %v2236_v9 = vld [vmem:[%s3133_s1 + $0x30] sm:$0xff]  ;;  %v2218_v10 = vld [vmem:[%s3133_s1 + $0x18] sm:$0xff]  ;;  %s2497_s14 = scalar_lea.vmem %s3132_s0, %s2257_s30  ;;  %v2254_v12 = vld [vmem:[%s3133_s1 + $0x48] sm:$0xff] }
   0xf   : > { %v2200_v11 = vld [vmem:[%s2497_s14] sm:$0xff]  ;;  %v2201_v13 = vld [vmem:[%s2497_s14 + $0x8] sm:$0xff]  ;;  %v2240_v15 = vld [vmem:[%s2497_s14 + $0x10] sm:$0xff]  ;;  %s3025_s23 = scalar_lea.vmem %s3135_s3, %s2258_s21 }
  0x10   : > { %621 = vmatpush.bf16.msra.mxu1 %v2216_v4  ;;  %880 = vmatpush.bf16.msra.mxu2 %v2237_v5  ;;  %v2239_v14 = vld [vmem:[%s2497_s14 + $0x8] sm:$0xff]  ;;  %v298_v16 = vshll.u32 %v2200_v11, 16  ;;  %v296_v18 = vshrl.u32 %v2200_v11, 16  ;;  %v303_v19 = vshll.u32 %v2201_v13, 16  ;;  %v1112_v22 = vshll.u32 %v2240_v15, 16  ;;  %v2202_v31 = vld [vmem:[%s2497_s14 + $0x10] sm:$0xff] }
  0x11   : > { %489 = vmatpush.bf16.msra.mxu0 %v2219_v6  ;;  %1297 = vmatpush.bf16.msra.mxu3 %v2255_v7  ;;  %v2221_v17 = vld [vmem:[%s2497_s14 + $0x8] sm:$0xff]  ;;  %v1105_v20 = vshrl.u32 %v2239_v14, 16  ;;  %v1107_v21 = vshll.u32 %v2239_v14, 16  ;;  %v2241_v32 = vld [vmem:[%s2497_s14 + $0x18] sm:$0xff]  ;;  %v307_v33 = vshrl.u32 %v2201_v13, 16  ;;  %v311_v34 = vshll.u32 %v2202_v31, 16 }
  0x12   : > { %v300_v23 = vrot.slane %v298_v16, 1  ;;  %v305_v24 = vrot.slane %v303_v19, 1  ;;  %v1114_v26 = vrot.slane %v1112_v22, 1  ;;  %v1116_v35 = vshrl.u32 %v2240_v15, 16  ;;  %v2222_v37 = vld [vmem:[%s2497_s14 + $0x10] sm:$0xff]  ;;  %v2203_v44 = vld [vmem:[%s2497_s14 + $0x18] sm:$0xff] }
  0x13   : > { %v1109_v25 = vrot.slane %v1107_v21, 1  ;;  %v1120_v36 = vshll.u32 %v2241_v32, 16  ;;  %v313_v39 = vrot.slane %v311_v34, 1  ;;  %v2242_v45 = vld [vmem:[%s2497_s14 + $0x20] sm:$0xff]  ;;  %v315_v46 = vshrl.u32 %v2202_v31, 16  ;;  %v2223_v50 = vld [vmem:[%s2497_s14 + $0x18] sm:$0xff] }
  0x14   : > { %622 = vmatpush.bf16.msra.mxu1 %v2215_v8  ;;  %881 = vmatpush.bf16.msra.mxu2 %v2236_v9  ;;  %v301_v27 = vor.u32 %v300_v23, %v296_v18  ;;  %v309_v38 = vor.u32 %v307_v33, %v305_v24  ;;  %v1118_v40 = vor.u32 %v1116_v35, %v1114_v26  ;;  %v319_v47 = vshll.u32 %v2203_v44, 16  ;;  %v2204_v57 = vld [vmem:[%s2497_s14 + $0x20] sm:$0xff]  ;;  %v2243_v58 = vld [vmem:[%s2497_s14 + $0x28] sm:$0xff]  ;;  %v2244_v7 = vld [vmem:[%s2497_s14 + $0x30] sm:$0xff] }
  0x15   : > { %490 = vmatpush.bf16.msra.mxu0 %v2218_v10  ;;  %1298 = vmatpush.bf16.msra.mxu3 %v2254_v12  ;;  %v1110_v28 = vor.u32 %v1109_v25, %v1105_v20  ;;  %v1122_v41 = vrot.slane %v1120_v36, 1  ;;  %v1124_v48 = vshrl.u32 %v2241_v32, 16  ;;  %v1128_v49 = vshll.u32 %v2242_v45, 16  ;;  %v2224_v63 = vld [vmem:[%s2497_s14 + $0x20] sm:$0xff]  ;;  %v2205_v6 = vld [vmem:[%s2497_s14 + $0x28] sm:$0xff]  ;;  %v2206_v19 = vld [vmem:[%s2497_s14 + $0x30] sm:$0xff] }
  0x16   : > { %v306_v29 = vsel %vm294_vm1, %v301_v27, %v305_v24  ;;  %v314_v42 = vsel %vm294_vm1, %v309_v38, %v313_v39  ;;  %v317_v51 = vor.u32 %v315_v46, %v313_v39  ;;  %v321_v52 = vrot.slane %v319_v47, 1  ;;  %v2225_v12 = vld [vmem:[%s2497_s14 + $0x28] sm:$0xff]  ;;  %v2245_v20 = vld [vmem:[%s2497_s14 + $0x38] sm:$0xff]  ;;  %v2226_v25 = vld [vmem:[%s2497_s14 + $0x30] sm:$0xff] }
  0x17   : > { %1997 = vmatmul.msk.bf16.vlgmr.msra.gmra.mxu1 %vm437_vm0, %v2200_v11  ;;  %2090 = vmatmul.msk.bf16.vlgmr.msra.gmra.mxu2 %vm437_vm0, %v2221_v17  ;;  %v1115_v30 = vsel %vm294_vm1, %v1110_v28, %v1114_v26  ;;  %v1123_v43 = vsel %vm294_vm1, %v1118_v40, %v1122_v41  ;;  %v1126_v53 = vor.u32 %v1124_v48, %v1122_v41  ;;  %v1130_v54 = vrot.slane %v1128_v49, 1  ;;  %v2207_v32 = vld [vmem:[%s2497_s14 + $0x38] sm:$0xff]  ;;  %v2246_v33 = vld [vmem:[%s2497_s14 + $0x40] sm:$0xff]  ;;  %v2247_v46 = vld [vmem:[%s2497_s14 + $0x48] sm:$0xff] }
  0x18   : > { %1970 = vmatmul.msk.bf16.vlgmr.msra.gmra.mxu0 %vm437_vm0, %v306_v29  ;;  %2183 = vmatmul.msk.bf16.vlgmr.msra.gmra.mxu3 %vm437_vm0, %v1115_v30  ;;  %v322_v55 = vsel %vm294_vm1, %v317_v51, %v321_v52  ;;  %v323_v59 = vshrl.u32 %v2203_v44, 16  ;;  %v327_v60 = vshll.u32 %v2204_v57, 16  ;;  %v1132_v61 = vshrl.u32 %v2242_v45, 16  ;;  %v2227_v38 = vld [vmem:[%s2497_s14 + $0x38] sm:$0xff]  ;;  %v2208_v45 = vld [vmem:[%s2497_s14 + $0x40] sm:$0xff] }
  0x19   : > { %v1131_v56 = vsel %vm294_vm1, %v1126_v53, %v1130_v54  ;;  %v1136_v62 = vshll.u32 %v2243_v58, 16  ;;  %v331_v8 = vshrl.u32 %v2204_v57, 16  ;;  %v335_v9 = vshll.u32 %v2205_v6, 16  ;;  %v2228_v51 = vld [vmem:[%s2497_s14 + $0x40] sm:$0xff] }
  0x1a   : > { %v325_v0 = vor.u32 %v323_v59, %v321_v52  ;;  %v329_v1 = vrot.slane %v327_v60, 1  ;;  %v1134_v2 = vor.u32 %v1132_v61, %v1130_v54  ;;  %v1140_v10 = vshrl.u32 %v2243_v58, 16  ;;  %v2209_v58 = vld [vmem:[%s2497_s14 + $0x48] sm:$0xff]  ;;  %v2248_v59 = vld [vmem:[%s2497_s14 + $0x50] sm:$0xff] }
  0x1b   : > { %v1138_v3 = vrot.slane %v1136_v62, 1  ;;  %v1144_v11 = vshll.u32 %v2244_v7, 16  ;;  %v337_v14 = vrot.slane %v335_v9, 1  ;;  %v339_v21 = vshrl.u32 %v2205_v6, 16 }
  0x1c   : > { %v330_v4 = vsel %vm294_vm1, %v325_v0, %v329_v1  ;;  %v343_v22 = vshll.u32 %v2206_v19, 16  ;;  %v1148_v23 = vshrl.u32 %v2244_v7, 16  ;;  %v1152_v24 = vshll.u32 %v2245_v20, 16  ;;  %v2229_v0 = vld [vmem:[%s2497_s14 + $0x48] sm:$0xff] }
  0x1d   : > { %v1139_v5 = vsel %vm294_vm1, %v1134_v2, %v1138_v3  ;;  %v1142_v15 = vor.u32 %v1140_v10, %v1138_v3  ;;  %v1146_v16 = vrot.slane %v1144_v11, 1  ;;  %v341_v26 = vor.u32 %v339_v21, %v337_v14  ;;  %v2586_v11 = vld [vmem:[%s2497_s14 + $0x50] sm:$0xff] }
  0x1e   : > { %v345_v27 = vrot.slane %v343_v22, 1  ;;  %v1154_v29 = vrot.slane %v1152_v24, 1  ;;  %v347_v34 = vshrl.u32 %v2206_v19, 16  ;;  %v351_v35 = vshll.u32 %v2207_v32, 16  ;;  %v2593_v24 = vld [vmem:[%s3134_s2] ss:$0 sm:$0xff] }
  0x1f   : > { %v1147_v18 = vsel %vm294_vm1, %v1142_v15, %v1146_v16  ;;  %v1150_v28 = vor.u32 %v1148_v23, %v1146_v16  ;;  %v1156_v36 = vshrl.u32 %v2245_v20, 16  ;;  %v355_v47 = vshrl.u32 %v2207_v32, 16 }
  0x20   : > { %v346_v30 = vsel %vm294_vm1, %v341_v26, %v345_v27  ;;  %v349_v39 = vor.u32 %v347_v34, %v345_v27  ;;  %v353_v40 = vrot.slane %v351_v35, 1  ;;  %v359_v48 = vshll.u32 %v2208_v45, 16  ;;  %v2230_v26 = vld [vmem:[%s2497_s14 + $0x50] sm:$0xff] }
  0x21   : > { %v1158_v41 = vor.u32 %v1156_v36, %v1154_v29  ;;  %v1164_v49 = vshrl.u32 %v2246_v33, 16  ;;  %v363_v60 = vshrl.u32 %v2208_v45, 16  ;;  %v367_v61 = vshll.u32 %v2209_v58, 16 }
  0x22   : > { %v357_v52 = vor.u32 %v355_v47, %v353_v40  ;;  %v361_v53 = vrot.slane %v359_v48, 1  ;;  %v1172_v62 = vshrl.u32 %v2247_v46, 16  ;;  %v1180_v20 = vshrl.u32 %v2248_v59, 16 }
  0x23   : > { %v369_v2 = vrot.slane %v367_v61, 1 }
  0x27   : > { %1998 = vmatmul.msk.bf16.gmra.mxu1 %vm437_vm0, %v2201_v13  ;;  %2091 = vmatmul.msk.bf16.gmra.mxu2 %vm437_vm0, %v2222_v37  ;;  %v333_v13 = vor.u32 %v331_v8, %v329_v1  ;;  %v1160_v37 = vshll.u32 %v2246_v33, 16  ;;  %v365_v1 = vor.u32 %v363_v60, %v361_v53 }
  0x28   : > { %1971 = vmatmul.msk.bf16.gmra.mxu0 %vm437_vm0, %v314_v42  ;;  %2184 = vmatmul.msk.bf16.gmra.mxu3 %vm437_vm0, %v1123_v43  ;;  %v354_v43 = vsel %vm294_vm1, %v349_v39, %v353_v40 }
  0x29   : > { %v338_v17 = vsel %vm294_vm1, %v333_v13, %v337_v14  ;;  %v1162_v42 = vrot.slane %v1160_v37, 1  ;;  %v370_v7 = vsel %vm294_vm1, %v365_v1, %v369_v2  ;;  %v2249_v13 = vld [vmem:[%s2497_s14 + $0x58] sm:$0xff] }
  0x2a   : > { %v1184_v21 = vshll.u32 %v2249_v13, 16 }
  0x2b   : > { %v1166_v54 = vor.u32 %v1164_v49, %v1162_v42 }
  0x37   : > { %1999 = vmatmul.msk.bf16.gmra.mxu1 %vm437_vm0, %v2202_v31  ;;  %2092 = vmatmul.msk.bf16.gmra.mxu2 %vm437_vm0, %v2223_v50  ;;  %v1155_v31 = vsel %vm294_vm1, %v1150_v28, %v1154_v29  ;;  %v1168_v50 = vshll.u32 %v2247_v46, 16 }
  0x38   : > { %1972 = vmatmul.msk.bf16.gmra.mxu0 %vm437_vm0, %v322_v55  ;;  %2185 = vmatmul.msk.bf16.gmra.mxu3 %vm437_vm0, %v1131_v56  ;;  %v362_v56 = vsel %vm294_vm1, %v357_v52, %v361_v53  ;;  %v1188_v53 = vshrl.u32 %v2249_v13, 16  ;;  %v2251_v13 = vld [vmem:[%s2497_s14 + $0x68] sm:$0xff] }
  0x39   : > { %v1170_v55 = vrot.slane %v1168_v50, 1  ;;  %v379_v50 = vshrl.u32 %v2586_v11, 16 }
  0x47   : > { %2000 = vmatmul.msk.bf16.gmra.mxu1 %vm437_vm0, %v2203_v44  ;;  %2093 = vmatmul.msk.bf16.gmra.mxu2 %vm437_vm0, %v2224_v63  ;;  %v1163_v44 = vsel %vm294_vm1, %v1158_v41, %v1162_v42  ;;  %v1176_v63 = vshll.u32 %v2248_v59, 16 }
  0x48   : > { %1973 = vmatmul.msk.bf16.gmra.mxu0 %vm437_vm0, %v330_v4  ;;  %2186 = vmatmul.msk.bf16.gmra.mxu3 %vm437_vm0, %v1139_v5  ;;  %v1174_v4 = vor.u32 %v1172_v62, %v1170_v55 }
  0x49   : > { %v1178_v5 = vrot.slane %v1176_v63, 1 }
  0x4b   : > { %v1179_v8 = vsel %vm294_vm1, %v1174_v4, %v1178_v5 }
  0x57   : > { %2001 = vmatmul.msk.bf16.gmra.mxu1 %vm437_vm0, %v2204_v57  ;;  %2094 = vmatmul.msk.bf16.gmra.mxu2 %vm437_vm0, %v2225_v12  ;;  %v1171_v57 = vsel %vm294_vm1, %v1166_v54, %v1170_v55 }
  0x58   : > { %1974 = vmatmul.msk.bf16.gmra.mxu0 %vm437_vm0, %v338_v17  ;;  %2187 = vmatmul.msk.bf16.gmra.mxu3 %vm437_vm0, %v1147_v18  ;;  %v371_v17 = vshrl.u32 %v2209_v58, 16  ;;  %v375_v18 = vshll.u32 %v2586_v11, 16 }
  0x5a   : > { %v373_v27 = vor.u32 %v371_v17, %v369_v2  ;;  %v377_v28 = vrot.slane %v375_v18, 1 }
  0x5c   : > { %v378_v36 = vsel %vm294_vm1, %v373_v27, %v377_v28  ;;  %v381_v59 = vor.u32 %v379_v50, %v377_v28  ;;  %v2232_v27 = vld [vmem:[%s2497_s14 + $0x60] sm:$0xff]  ;;  %v2252_v50 = vld [vmem:[%s2497_s14 + $0x70] sm:$0xff] }
  0x67   : > { %2002 = vmatmul.msk.bf16.gmra.mxu1 %vm437_vm0, %v2205_v6  ;;  %2095 = vmatmul.msk.bf16.gmra.mxu2 %vm437_vm0, %v2226_v25 }
  0x68   : > { %1975 = vmatmul.msk.bf16.gmra.mxu0 %vm437_vm0, %v346_v30  ;;  %2188 = vmatmul.msk.bf16.gmra.mxu3 %vm437_vm0, %v1155_v31  ;;  %v1182_v30 = vor.u32 %v1180_v20, %v1178_v5  ;;  %v1186_v31 = vrot.slane %v1184_v21, 1 }
  0x6a   : > { %v1187_v37 = vsel %vm294_vm1, %v1182_v30, %v1186_v31  ;;  %v1190_v62 = vor.u32 %v1188_v53, %v1186_v31 }
  0x77   : > { %2003 = vmatmul.msk.bf16.gmra.mxu1 %vm437_vm0, %v2206_v19  ;;  %2096 = vmatmul.msk.bf16.gmra.mxu2 %vm437_vm0, %v2227_v38 }
  0x78   : > { %1976 = vmatmul.msk.bf16.gmra.mxu0 %vm437_vm0, %v354_v43  ;;  %2189 = vmatmul.msk.bf16.gmra.mxu3 %vm437_vm0, %v1163_v44  ;;  %v2611_v43 = vld [vmem:[%s2497_s14 + $0x58] sm:$0xff] }
  0x79   : > { %v387_v18 = vshrl.u32 %v2611_v43, 16 }
  0x87   : > { %2004 = vmatmul.msk.bf16.gmra.mxu1 %vm437_vm0, %v2207_v32  ;;  %2097 = vmatmul.msk.bf16.gmra.mxu2 %vm437_vm0, %v2228_v51  ;;  %v383_v51 = vshll.u32 %v2611_v43, 16 }
  0x88   : > { %1977 = vmatmul.msk.bf16.gmra.mxu0 %vm437_vm0, %v362_v56  ;;  %2190 = vmatmul.msk.bf16.gmra.mxu3 %vm437_vm0, %v1171_v57 }
  0x89   : > { %v385_v60 = vrot.slane %v383_v51, 1 }
  0x8b   : > { %v386_v4 = vsel %vm294_vm1, %v381_v59, %v385_v60  ;;  %v389_v28 = vor.u32 %v387_v18, %v385_v60  ;;  %v1208_v59 = vshll.u32 %v2252_v50, 16 }
  0x94   : > { %v624_v3 = vpop.f32.mrf.mxu1 }
  0x95   : > { %v492_v6 = vpop.f32.mrf.mxu0 }
  0x96   : > { %v625_v10 = vadd.f32 %v624_v3, %v492_v6 }
  0x97   : > { %2005 = vmatmul.msk.bf16.gmra.mxu1 %vm437_vm0, %v2208_v45  ;;  %2098 = vmatmul.msk.bf16.gmra.mxu2 %vm437_vm0, %v2229_v0  ;;  %v2250_v45 = vld [vmem:[%s2497_s14 + $0x60] sm:$0xff] }
  0x98   : > { %1978 = vmatmul.msk.bf16.gmra.mxu0 %vm437_vm0, %v370_v7  ;;  %2191 = vmatmul.msk.bf16.gmra.mxu3 %vm437_vm0, %v1179_v8  ;;  %v1192_v54 = vshll.u32 %v2250_v45, 16  ;;  %v1196_v21 = vshrl.u32 %v2250_v45, 16 }
  0x9a   : > { %v883_v9 = vpop.f32.mrf.mxu2  ;;  %v1194_v63 = vrot.slane %v1192_v54, 1 }
  0x9b   : > { %v1300_v14 = vpop.f32.mrf.mxu3  ;;  %v958_v15 = vadd.f32 %v883_v9, %v625_v10 }
  0x9c   : > { %v626_v12 = vpop.f32.mrf.mxu1  ;;  %v1195_v5 = vsel %vm294_vm1, %v1190_v62, %v1194_v63  ;;  %v1198_v31 = vor.u32 %v1196_v21, %v1194_v63  ;;  %v2233_v63 = vld [vmem:[%s2497_s14 + $0x68] sm:$0xff] }
  0x9d   : > { %v494_v16 = vpop.f32.mrf.mxu0  ;;  %v1375_v23 = vadd.f32 %v1300_v14, %v958_v15 }
  0x9e   : > { %v627_v19 = vadd.f32 %v626_v12, %v494_v16 }
  0x9f   : > { %v2597_v33 = vadd.f32 %v2593_v24, %v1375_v23 }
  0xa1   : > { %v1439_v40 = vmax.f32 %v2597_v33, 0.0 }
  0xa2   : > { %v885_v22 = vpop.f32.mrf.mxu2 }
  0xa3   : > { %v959_v25 = vadd.f32 %v885_v22, %v627_v19  ;;  %v1302_v32 = vpop.f32.mrf.mxu3  ;;  %v1200_v22 = vshll.u32 %v2251_v13, 16 }
  0xa4   : > { %v629_v29 = vpop.f32.mrf.mxu1 }
  0xa5   : > { %v1376_v34 = vadd.f32 %v1302_v32, %v959_v25  ;;  %v497_v35 = vpop.f32.mrf.mxu0  ;;  %v1202_v32 = vrot.slane %v1200_v22, 1  ;;  %v2253_v22 = vld [vmem:[%s2497_s14 + $0x78] sm:$0xff] }
  0xa6   : > { %v630_v41 = vadd.f32 %v629_v29, %v497_v35 }
  0xa7   : > { %2006 = vmatmul.msk.bf16.gmra.mxu1 %vm437_vm0, %v2209_v58  ;;  %2099 = vmatmul.msk.bf16.gmra.mxu2 %vm437_vm0, %v2230_v26  ;;  %v2604_v38 = vadd.f32 %v2593_v24, %v1376_v34  ;;  %v2231_v58 = vld [vmem:[%s2497_s14 + $0x58] sm:$0xff] }
  0xa8   : > { %1979 = vmatmul.msk.bf16.gmra.mxu0 %vm437_vm0, %v378_v36  ;;  %2192 = vmatmul.msk.bf16.gmra.mxu3 %vm437_vm0, %v1187_v37 }
  0xa9   : > { %v1440_v42 = vmax.f32 %v2604_v38, 0.0 }
  0xaa   : > { %v888_v39 = vpop.f32.mrf.mxu2 }
  0xab   : > { %v2269_v46 = vpack.i.bf16 %v1440_v42, %v1439_v40  ;;  %v1305_v47 = vpop.f32.mrf.mxu3  ;;  %v960_v48 = vadd.f32 %v888_v39, %v630_v41  ;;  %v1203_v41 = vsel %vm294_vm1, %v1198_v31, %v1202_v32  ;;  %v1212_v31 = vshrl.u32 %v2252_v50, 16 }
  0xac   : > { %v631_v44 = vpop.f32.mrf.mxu1 }
  0xad   : > { %2270 = vrot.lane.b32.xlu0 %v2269_v46, %s2428_s19  ;;  %v499_v49 = vpop.f32.mrf.mxu0  ;;  %v1377_v56 = vadd.f32 %v1305_v47, %v960_v48 }
  0xae   : > { %v632_v52 = vadd.f32 %v631_v44, %v499_v49 }
  0xaf   : > { %v2623_v1 = vadd.f32 %v2593_v24, %v1377_v56 }
  0xb1   : > { %v1441_v8 = vmax.f32 %v2623_v1, 0.0 }
  0xb2   : > { %v890_v55 = vpop.f32.mrf.mxu2 }
  0xb3   : > { %v961_v57 = vadd.f32 %v890_v55, %v632_v52  ;;  %v1307_v0 = vpop.f32.mrf.mxu3 }
  0xb4   : > { %v634_v61 = vpop.f32.mrf.mxu1 }
  0xb5   : > { %v1378_v2 = vadd.f32 %v1307_v0, %v961_v57  ;;  %v502_v3 = vpop.f32.mrf.mxu0 }
  0xb6   : > { %v635_v10 = vadd.f32 %v634_v61, %v502_v3 }
  0xb7   : > { %2007 = vmatmul.msk.bf16.gmra.mxu1 %vm437_vm0, %v2586_v11  ;;  %2100 = vmatmul.msk.bf16.gmra.mxu2 %vm437_vm0, %v2231_v58  ;;  %v2631_v6 = vadd.f32 %v2593_v24, %v1378_v2  ;;  %v2638_v11 = vld [vmem:[%s2497_s14 + $0x60] sm:$0xff]  ;;  %v1204_v58 = vshrl.u32 %v2251_v13, 16 }
  0xb8   : > { %1980 = vmatmul.msk.bf16.gmra.mxu0 %vm437_vm0, %v386_v4  ;;  %2193 = vmatmul.msk.bf16.gmra.mxu3 %vm437_vm0, %v1195_v5  ;;  %v391_v19 = vshll.u32 %v2638_v11, 16  ;;  %v395_v55 = vshrl.u32 %v2638_v11, 16  ;;  %v1210_v5 = vrot.slane %v1208_v59, 1 }
  0xb9   : > { %v1442_v9 = vmax.f32 %v2631_v6, 0.0  ;;  %v1206_v4 = vor.u32 %v1204_v58, %v1202_v32  ;;  %v1216_v32 = vshll.u32 %v2253_v22, 16 }
  0xba   : > { %v893_v7 = vpop.f32.mrf.mxu2  ;;  %v393_v29 = vrot.slane %v391_v19, 1 }
  0xbb   : > { %v2274_v14 = vpack.i.bf16 %v1442_v9, %v1441_v8  ;;  %v1310_v15 = vpop.f32.mrf.mxu3  ;;  %v962_v16 = vadd.f32 %v893_v7, %v635_v10 }
  0xbc   : > { %v636_v12 = vpop.f32.mrf.mxu1  ;;  %v394_v39 = vsel %vm294_vm1, %v389_v28, %v393_v29  ;;  %v397_v0 = vor.u32 %v395_v55, %v393_v29 }
  0xbd   : > { %2275 = vrot.lane.b32.xlu0 %v2274_v14, %s2428_s19  ;;  %v504_v17 = vpop.f32.mrf.mxu0  ;;  %v1379_v25 = vadd.f32 %v1310_v15, %v962_v16  ;;  %v1211_v15 = vsel %vm294_vm1, %v1206_v4, %v1210_v5 }
  0xbe   : > { %v637_v20 = vadd.f32 %v636_v12, %v504_v17 }
  0xbf   : > { %v2650_v35 = vadd.f32 %v2593_v24, %v1379_v25 }
  0xc1   : > { %v1443_v46 = vmax.f32 %v2650_v35, 0.0 }
  0xc2   : > { %v895_v23 = vpop.f32.mrf.mxu2 }
  0xc3   : > { %v963_v26 = vadd.f32 %v895_v23, %v637_v20  ;;  %v1312_v34 = vpop.f32.mrf.mxu3 }
  0xc4   : > { %v639_v30 = vpop.f32.mrf.mxu1 }
  0xc5   : > { %v1380_v36 = vadd.f32 %v1312_v34, %v963_v26  ;;  %v507_v37 = vpop.f32.mrf.mxu0 }
  0xc6   : > { %v640_v47 = vadd.f32 %v639_v30, %v507_v37 }
  0xc7   : > { %2008 = vmatmul.msk.bf16.gmra.mxu1 %vm437_vm0, %v2611_v43  ;;  %2101 = vmatmul.msk.bf16.gmra.mxu2 %vm437_vm0, %v2232_v27  ;;  %v2658_v44 = vadd.f32 %v2593_v24, %v1380_v36  ;;  %v2665_v43 = vld [vmem:[%s2497_s14 + $0x68] sm:$0xff] }
  0xc8   : > { %1981 = vmatmul.msk.bf16.gmra.mxu0 %vm437_vm0, %v394_v39  ;;  %2194 = vmatmul.msk.bf16.gmra.mxu3 %vm437_vm0, %v1203_v41  ;;  %v399_v56 = vshll.u32 %v2665_v43, 16  ;;  %v403_v28 = vshrl.u32 %v2665_v43, 16  ;;  %v2234_v39 = vld [vmem:[%s2497_s14 + $0x70] sm:$0xff] }
  0xc9   : > { %v1444_v48 = vmax.f32 %v2658_v44, 0.0 }
  0xca   : > { %v898_v45 = vpop.f32.mrf.mxu2  ;;  %v401_v2 = vrot.slane %v399_v56, 1 }
  0xcb   : > { %v2279_v51 = vpack.i.bf16 %v1444_v48, %v1443_v46  ;;  %v1315_v52 = vpop.f32.mrf.mxu3  ;;  %v964_v53 = vadd.f32 %v898_v45, %v640_v47 }
  0xcc   : > { %v641_v49 = vpop.f32.mrf.mxu1  ;;  %v402_v13 = vsel %vm294_vm1, %v397_v0, %v401_v2  ;;  %v405_v41 = vor.u32 %v403_v28, %v401_v2 }
  0xcd   : > { %2280 = vrot.lane.b32.xlu1 %v2279_v51, %s2428_s19  ;;  %v509_v54 = vpop.f32.mrf.mxu0  ;;  %v1381_v61 = vadd.f32 %v1315_v52, %v964_v53  ;;  %v1218_v51 = vrot.slane %v1216_v32, 1  ;;  %v208_v52 = vld [vmem:[%s2497_s14 + $0x78] sm:$0x1]  ;;  %v1018_v53 = vld [vmem:[%s2497_s14 + $0x80] sm:$0x1] }
  0xce   : > { %v642_v57 = vadd.f32 %v641_v49, %v509_v54  ;;  %v1214_v49 = vor.u32 %v1212_v31, %v1210_v5  ;;  %v277_v58 = vunpack.c.l.b16 %v208_v52 }
  0xcf   : > { %v2677_v10 = vadd.f32 %v2593_v24, %v1381_v61 }
  0xd0   : > { %v1219_v59 = vsel %vm294_vm1, %v1214_v49, %v1218_v51 }
  0xd1   : > { %v1445_v18 = vmax.f32 %v2677_v10, 0.0 }
  0xd2   : > { %v900_v60 = vpop.f32.mrf.mxu2 }
  0xd3   : > { %v965_v62 = vadd.f32 %v900_v60, %v642_v57  ;;  %v1317_v7 = vpop.f32.mrf.mxu3  ;;  %v1087_v60 = vunpack.c.l.b16 %v1018_v53 }
  0xd4   : > { %v644_v3 = vpop.f32.mrf.mxu1 }
  0xd5   : > { %v1382_v12 = vadd.f32 %v1317_v7, %v965_v62  ;;  %v512_v14 = vpop.f32.mrf.mxu0  ;;  %v1103_v4 = vpack.c.b16 %v1087_v60, %v1087_v60 }
  0xd6   : > { %v645_v20 = vadd.f32 %v644_v3, %v512_v14 }
  0xd7   : > { %2009 = vmatmul.msk.bf16.gmra.mxu1 %vm437_vm0, %v2638_v11  ;;  %2102 = vmatmul.msk.bf16.gmra.mxu2 %vm437_vm0, %v2233_v63  ;;  %v2685_v16 = vadd.f32 %v2593_v24, %v1382_v12  ;;  %v2692_v11 = vld [vmem:[%s2497_s14 + $0x70] sm:$0xff] }
  0xd8   : > { %1982 = vmatmul.msk.bf16.gmra.mxu0 %vm437_vm0, %v402_v13  ;;  %2195 = vmatmul.msk.bf16.gmra.mxu3 %vm437_vm0, %v1211_v15  ;;  %v407_v29 = vshll.u32 %v2692_v11, 16  ;;  %v411_v13 = vshrl.u32 %v2692_v11, 16 }
  0xd9   : > { %v1446_v19 = vmax.f32 %v2685_v16, 0.0 }
  0xda   : > { %v903_v17 = vpop.f32.mrf.mxu2  ;;  %v409_v45 = vrot.slane %v407_v29, 1 }
  0xdb   : > { %v2284_v23 = vpack.i.bf16 %v1446_v19, %v1445_v18  ;;  %v1320_v25 = vpop.f32.mrf.mxu3  ;;  %v966_v26 = vadd.f32 %v903_v17, %v645_v20  ;;  %v1220_v20 = vshrl.u32 %v2253_v22, 16 }
  0xdc   : > { %v646_v21 = vpop.f32.mrf.mxu1  ;;  %v410_v50 = vsel %vm294_vm1, %v405_v41, %v409_v45  ;;  %v413_v28 = vor.u32 %v411_v13, %v409_v45 }
  0xdd   : > { %2285 = vrot.lane.b32.xlu1 %v2284_v23, %s2428_s19  ;;  %v514_v27 = vpop.f32.mrf.mxu0  ;;  %v1383_v36 = vadd.f32 %v1320_v25, %v966_v26  ;;  %v1222_v31 = vor.u32 %v1220_v20, %v1218_v51 }
  0xde   : > { %v647_v30 = vadd.f32 %v646_v21, %v514_v27  ;;  %v1224_v21 = vshll.u32 %v1103_v4, 16  ;;  %v2235_v27 = vld [vmem:[%s2497_s14 + $0x78] sm:$0xff] }
  0xdf   : > { %v2706_v55 = vadd.f32 %v2593_v24, %v1383_v36 }
  0xe0   : > { %v1226_v32 = vrot.slane %v1224_v21, 1 }
  0xe1   : > { %v1447_v63 = vmax.f32 %v2706_v55, 0.0 }
  0xe2   : > { %v905_v34 = vpop.f32.mrf.mxu2  ;;  %v1227_v41 = vsel %vm294_vm1, %v1222_v31, %v1226_v32 }
  0xe3   : > { %v967_v37 = vadd.f32 %v905_v34, %v647_v30  ;;  %v1322_v54 = vpop.f32.mrf.mxu3 }
  0xe4   : > { %v649_v47 = vpop.f32.mrf.mxu1 }
  0xe5   : > { %v1384_v56 = vadd.f32 %v1322_v54, %v967_v37  ;;  %v517_v57 = vpop.f32.mrf.mxu0 }
  0xe6   : > { %v650_v2 = vadd.f32 %v649_v47, %v517_v57 }
  0xe7   : > { %2010 = vmatmul.msk.bf16.gmra.mxu1 %vm437_vm0, %v2665_v43  ;;  %2103 = vmatmul.msk.bf16.gmra.mxu2 %vm437_vm0, %v2234_v39  ;;  %v2714_v61 = vadd.f32 %v2593_v24, %v1384_v56  ;;  %v293_v43 = vpack.c.b16 %v277_v58, %v277_v58 }
  0xe8   : > { %1983 = vmatmul.msk.bf16.gmra.mxu0 %vm437_vm0, %v410_v50  ;;  %2196 = vmatmul.msk.bf16.gmra.mxu3 %vm437_vm0, %v1219_v59 }
  0xe9   : > { %v1448_v0 = vmax.f32 %v2714_v61, 0.0  ;;  %v415_v15 = vshll.u32 %v293_v43, 16 }
  0xea   : > { %v908_v62 = vpop.f32.mrf.mxu2 }
  0xeb   : > { %v2289_v5 = vpack.i.bf16 %v1448_v0, %v1447_v63  ;;  %v1325_v7 = vpop.f32.mrf.mxu3  ;;  %v968_v12 = vadd.f32 %v908_v62, %v650_v2  ;;  %v417_v29 = vrot.slane %v415_v15, 1 }
  0xec   : > { %v651_v3 = vpop.f32.mrf.mxu1 }
  0xed   : > { %2290 = vrot.lane.b32.xlu2 %v2289_v5, %s2428_s19  ;;  %v519_v14 = vpop.f32.mrf.mxu0  ;;  %v1385_v25 = vadd.f32 %v1325_v7, %v968_v12  ;;  %v418_v22 = vsel %vm294_vm1, %v413_v28, %v417_v29 }
  0xee   : > { %v652_v17 = vadd.f32 %v651_v3, %v519_v14 }
  0xef   : > { %v2728_v36 = vadd.f32 %v2593_v24, %v1385_v25 }
  0xf1   : > { %v1449_v49 = vmax.f32 %v2728_v36, 0.0 }
  0xf2   : > { %v910_v23 = vpop.f32.mrf.mxu2 }
  0xf3   : > { %v969_v26 = vadd.f32 %v910_v23, %v652_v17  ;;  %v1327_v34 = vpop.f32.mrf.mxu3 }
  0xf4   : > { %v654_v30 = vpop.f32.mrf.mxu1 }
  0xf5   : > { %v1386_v37 = vadd.f32 %v1327_v34, %v969_v26  ;;  %v522_v39 = vpop.f32.mrf.mxu0 }
  0xf6   : > { %v655_v52 = vadd.f32 %v654_v30, %v522_v39 }
  0xf7   : > { %2104 = vmatmul.msk.bf16.gmra.mxu2 %vm437_vm0, %v2235_v27  ;;  %2011 = vmatmul.msk.bf16.gmra.mxu1 %vm437_vm0, %v2692_v11  ;;  %v2736_v45 = vadd.f32 %v2593_v24, %v1386_v37 }
  0xf8   : > { %1984 = vmatmul.msk.bf16.gmra.mxu0 %vm437_vm0, %v418_v22  ;;  %2197 = vmatmul.msk.bf16.gmra.mxu3 %vm437_vm0, %v1227_v41 }
  0xf9   : > { %v1450_v51 = vmax.f32 %v2736_v45, 0.0 }
  0xfa   : > { %v913_v47 = vpop.f32.mrf.mxu2 }
  0xfb   : > { %v2294_v11 = vpack.i.bf16 %v1450_v51, %v1449_v49  ;;  %v1330_v54 = vpop.f32.mrf.mxu3  ;;  %v970_v56 = vadd.f32 %v913_v47, %v655_v52 }
  0xfc   : > { %v656_v53 = vpop.f32.mrf.mxu1 }
  0xfd   : > { %2295 = vrot.lane.b32.xlu2 %v2294_v11, %s2428_s19  ;;  %v524_v57 = vpop.f32.mrf.mxu0  ;;  %v1387_v59 = vadd.f32 %v1330_v54, %v970_v56 }
  0xfe   : > { %v657_v50 = vadd.f32 %v656_v53, %v524_v57 }
  0xff   : > { %v2748_v43 = vadd.f32 %v2593_v24, %v1387_v59 }
 0x101   : > { %v1451_v12 = vmax.f32 %v2748_v43, 0.0 }
 0x102   : > { %v915_v58 = vpop.f32.mrf.mxu2 }
 0x103   : > { %v971_v60 = vadd.f32 %v915_v58, %v657_v50  ;;  %v1332_v2 = vpop.f32.mrf.mxu3 }
 0x104   : > { %v659_v62 = vpop.f32.mrf.mxu1 }
 0x105   : > { %v1388_v3 = vadd.f32 %v1332_v2, %v971_v60  ;;  %v527_v4 = vpop.f32.mrf.mxu0 }
 0x106   : > { %v660_v13 = vadd.f32 %v659_v62, %v527_v4 }
 0x107   : > { %v2751_v5 = vadd.f32 %v2593_v24, %v1388_v3 }
 0x109   : > { %v1452_v14 = vmax.f32 %v2751_v5, 0.0 }
 0x10a   : > { %v918_v7 = vpop.f32.mrf.mxu2 }
 0x10b   : > { %v2299_v17 = vpack.i.bf16 %v1452_v14, %v1451_v12  ;;  %v1335_v20 = vpop.f32.mrf.mxu3  ;;  %v972_v21 = vadd.f32 %v918_v7, %v660_v13 }
 0x10c   : > { %v661_v15 = vpop.f32.mrf.mxu1 }
 0x10d   : > { %2300 = vrot.lane.b32.xlu0 %v2299_v17, %s2428_s19  ;;  %v529_v23 = vpop.f32.mrf.mxu0  ;;  %v1389_v27 = vadd.f32 %v1335_v20, %v972_v21 }
 0x10e   : > { %v662_v25 = vadd.f32 %v661_v15, %v529_v23 }
 0x10f   : > { %v2761_v31 = vadd.f32 %v2593_v24, %v1389_v27 }
 0x111   : > { %v1453_v22 = vmax.f32 %v2761_v31, 0.0 }
 0x112   : > { %v920_v26 = vpop.f32.mrf.mxu2 }
 0x113   : > { %v973_v28 = vadd.f32 %v920_v26, %v662_v25  ;;  %v1337_v30 = vpop.f32.mrf.mxu3 }
 0x114   : > { %v664_v29 = vpop.f32.mrf.mxu1 }
 0x115   : > { %v1390_v32 = vadd.f32 %v1337_v30, %v973_v28  ;;  %v532_v34 = vpop.f32.mrf.mxu0 }
 0x116   : > { %v665_v47 = vadd.f32 %v664_v29, %v532_v34 }
 0x117   : > { %v2764_v37 = vadd.f32 %v2593_v24, %v1390_v32 }
 0x119   : > { %v1454_v41 = vmax.f32 %v2764_v37, 0.0 }
 0x11a   : > { %v923_v39 = vpop.f32.mrf.mxu2 }
 0x11b   : > { %v2304_v53 = vpack.i.bf16 %v1454_v41, %v1453_v22  ;;  %v1340_v11 = vpop.f32.mrf.mxu3  ;;  %v974_v54 = vadd.f32 %v923_v39, %v665_v47 }
 0x11c   : > { %v666_v52 = vpop.f32.mrf.mxu1 }
 0x11d   : > { %2305 = vrot.lane.b32.xlu1 %v2304_v53, %s2428_s19  ;;  %v534_v56 = vpop.f32.mrf.mxu0  ;;  %v1391_v58 = vadd.f32 %v1340_v11, %v974_v54 }
 0x11e   : > { %v667_v57 = vadd.f32 %v666_v52, %v534_v56 }
 0x11f   : > { %v2774_v2 = vadd.f32 %v2593_v24, %v1391_v58 }
 0x121   : > { %v3142_v15 = vmax.f32 %v2774_v2, 0.0  ;;  %v3145_v45 = vmax.f32 %v2774_v2, 0.0 }
 0x122   : > { %v925_v50 = vpop.f32.mrf.mxu2 }
 0x123   : > { %v975_v59 = vadd.f32 %v925_v50, %v667_v57  ;;  %v1342_v62 = vpop.f32.mrf.mxu3 }
 0x124   : > { %v669_v60 = vpop.f32.mrf.mxu1 }
 0x125   : > { %v1392_v3 = vadd.f32 %v1342_v62, %v975_v59  ;;  %v537_v4 = vpop.f32.mrf.mxu0 }
 0x126   : > { %v670_v20 = vadd.f32 %v669_v60, %v537_v4 }
 0x127   : > { %v2777_v7 = vadd.f32 %v2593_v24, %v1392_v3 }
 0x129   : > { %v1456_v17 = vmax.f32 %v2777_v7, 0.0 }
 0x12a   : > { %v928_v13 = vpop.f32.mrf.mxu2 }
 0x12b   : > { %v2309_v23 = vpack.i.bf16 %v1456_v17, %v3142_v15  ;;  %v1345_v25 = vpop.f32.mrf.mxu3  ;;  %v976_v26 = vadd.f32 %v928_v13, %v670_v20 }
 0x12c   : > { %v671_v21 = vpop.f32.mrf.mxu1 }
 0x12d   : > { %2310 = vrot.lane.b32.xlu2 %v2309_v23, %s2428_s19  ;;  %v539_v27 = vpop.f32.mrf.mxu0  ;;  %v1393_v30 = vadd.f32 %v1345_v25, %v976_v26 }
 0x12e   : > { %v672_v28 = vadd.f32 %v671_v21, %v539_v27 }
 0x12f   : > { %v2787_v47 = vadd.f32 %v2593_v24, %v1393_v30 }
 0x131   : > { %v3138_v56 = vmax.f32 %v2787_v47, 0.0  ;;  %v3147_v7 = vmax.f32 %v2787_v47, 0.0 }
 0x132   : > { %v930_v29 = vpop.f32.mrf.mxu2 }
 0x133   : > { %v977_v32 = vadd.f32 %v930_v29, %v672_v28  ;;  %v1347_v39 = vpop.f32.mrf.mxu3 }
 0x134   : > { %v674_v34 = vpop.f32.mrf.mxu1 }
 0x135   : > { %v1394_v52 = vadd.f32 %v1347_v39, %v977_v32  ;;  %v542_v53 = vpop.f32.mrf.mxu0 }
 0x136   : > { %v675_v50 = vadd.f32 %v674_v34, %v542_v53 }
 0x137   : > { %v2790_v11 = vadd.f32 %v2593_v24, %v1394_v52 }
 0x139   : > { %v3141_v57 = vmax.f32 %v2790_v11, 0.0 }
 0x13a   : > { %v933_v54 = vpop.f32.mrf.mxu2 }
 0x13b   : > { %v2314_v59 = vpack.i.bf16 %v3141_v57, %v3138_v56  ;;  %v1350_v60 = vpop.f32.mrf.mxu3  ;;  %v978_v62 = vadd.f32 %v933_v54, %v675_v50 }
 0x13c   : > { %v676_v58 = vpop.f32.mrf.mxu1 }
 0x13d   : > { %2315 = vrot.lane.b32.xlu0 %v2314_v59, %s2428_s19  ;;  %v544_v3 = vpop.f32.mrf.mxu0  ;;  %v1395_v20 = vadd.f32 %v1350_v60, %v978_v62 }
 0x13e   : > { %v677_v4 = vadd.f32 %v676_v58, %v544_v3 }
 0x13f   : > { %v2800_v26 = vadd.f32 %v2593_v24, %v1395_v20 }
 0x141   : > { %v3136_v32 = vmax.f32 %v2800_v26, 0.0 }
 0x142   : > { %v935_v13 = vpop.f32.mrf.mxu2 }
 0x143   : > { %v979_v21 = vadd.f32 %v935_v13, %v677_v4  ;;  %v1352_v25 = vpop.f32.mrf.mxu3 }
 0x144   : > { %v679_v23 = vpop.f32.mrf.mxu1 }
 0x145   : > { %v1396_v27 = vadd.f32 %v1352_v25, %v979_v21  ;;  %v547_v28 = vpop.f32.mrf.mxu0 }
 0x146   : > { %v680_v39 = vadd.f32 %v679_v23, %v547_v28 }
 0x147   : > { %v2803_v29 = vadd.f32 %v2593_v24, %v1396_v27 }
 0x149   : > { %v3137_v34 = vmax.f32 %v2803_v29, 0.0 }
 0x14a   : > { %v938_v30 = vpop.f32.mrf.mxu2 }
 0x14b   : > { %v2319_v53 = vpack.i.bf16 %v3137_v34, %v3136_v32  ;;  %v1355_v54 = vpop.f32.mrf.mxu3  ;;  %v980_v50 = vadd.f32 %v938_v30, %v680_v39  ;;  %v2271_v34 = vpop.permute.xlu0 %2270 }
 0x14c   : > { %v681_v52 = vpop.f32.mrf.mxu1 }
 0x14d   : > { %2320 = vrot.lane.b32.xlu1 %v2319_v53, %s2428_s19  ;;  %v549_v58 = vpop.f32.mrf.mxu0  ;;  %v1397_v62 = vadd.f32 %v1355_v54, %v980_v50 }
 0x14e   : > { %v682_v59 = vadd.f32 %v681_v52, %v549_v58 }
 0x14f   : > { %v2813_v20 = vadd.f32 %v2593_v24, %v1397_v62 }
 0x151   : > { %v3139_v28 = vmax.f32 %v2813_v20, 0.0 }
 0x152   : > { %v940_v60 = vpop.f32.mrf.mxu2 }
 0x153   : > { %v981_v3 = vadd.f32 %v940_v60, %v682_v59  ;;  %v1357_v13 = vpop.f32.mrf.mxu3 }
 0x154   : > { %v684_v4 = vpop.f32.mrf.mxu1 }
 0x155   : > { %v1398_v21 = vadd.f32 %v1357_v13, %v981_v3  ;;  %v552_v23 = vpop.f32.mrf.mxu0 }
 0x156   : > { %v685_v39 = vadd.f32 %v684_v4, %v552_v23 }
 0x157   : > { %v2816_v25 = vadd.f32 %v2593_v24, %v1398_v21 }
 0x159   : > { %v3140_v30 = vmax.f32 %v2816_v25, 0.0 }
 0x15a   : > { %v943_v27 = vpop.f32.mrf.mxu2 }
 0x15b   : > { %v2324_v53 = vpack.i.bf16 %v3140_v30, %v3139_v28  ;;  %v1360_v54 = vpop.f32.mrf.mxu3  ;;  %v982_v50 = vadd.f32 %v943_v27, %v685_v39  ;;  %v2831_v28 = vpop.permute.xlu1 %2280 }
 0x15c   : > { %v686_v52 = vpop.f32.mrf.mxu1 }
 0x15d   : > { %2325 = vrot.lane.b32.xlu2 %v2324_v53, %s2428_s19  ;;  %v554_v58 = vpop.f32.mrf.mxu0  ;;  %v1399_v62 = vadd.f32 %v1360_v54, %v982_v50  ;;  %v2273_v50 = vunpack.i.h.bf16 %v2271_v34 }
 0x15e   : > { %v687_v59 = vadd.f32 %v686_v52, %v554_v58  ;;  %v2272_v58 = vunpack.i.l.bf16 %v2271_v34 }
 0x15f   : > { %v2826_v32 = vadd.f32 %v2593_v24, %v1399_v62 }
 0x161   : > { %v3143_v39 = vmax.f32 %v2826_v32, 0.0 }
 0x162   : > { %v945_v60 = vpop.f32.mrf.mxu2 }
 0x163   : > { %v983_v3 = vadd.f32 %v945_v60, %v687_v59  ;;  %v1362_v21 = vpop.f32.mrf.mxu3  ;;  %v2286_v34 = vpop.permute.xlu1 %2285 }
 0x164   : > { %v689_v13 = vpop.f32.mrf.mxu1 }
 0x165   : > { %v1400_v4 = vadd.f32 %v1362_v21, %v983_v3  ;;  %v557_v23 = vpop.f32.mrf.mxu0 }
 0x166   : > { %v690_v53 = vadd.f32 %v689_v13, %v557_v23  ;;  %v2846_v13 = vmax.f32 %v1439_v40, %v2272_v58  ;;  %v2276_v40 = vpop.permute.xlu0 %2275 }
 0x167   : > { %v2829_v56 = vadd.f32 %v2593_v24, %v1400_v4  ;;  %v2842_v4 = vmax.f32 %v1440_v42, %v2273_v50 }
 0x169   : > { %v3144_v52 = vmax.f32 %v2829_v56, 0.0 }
 0x16a   : > { %v948_v27 = vpop.f32.mrf.mxu2 }
 0x16b   : > { %v2329_v59 = vpack.i.bf16 %v3144_v52, %v3143_v39  ;;  %v1365_v60 = vpop.f32.mrf.mxu3  ;;  %v984_v62 = vadd.f32 %v948_v27, %v690_v53  ;;  %v2288_v39 = vunpack.i.h.bf16 %v2286_v34  ;;  %v2287_v52 = vunpack.i.l.bf16 %v2286_v34 }
 0x16c   : > { %v691_v54 = vpop.f32.mrf.mxu1  ;;  %v2344_v27 = vpack.i.bf16 %v2842_v4, %v2846_v13 }
 0x16d   : > { %2330 = vrot.lane.b32.xlu0 %v2329_v59, %s2428_s19  ;;  %v559_v3 = vpop.f32.mrf.mxu0  ;;  %v1401_v30 = vadd.f32 %v1365_v60, %v984_v62  ;;  %v2856_v42 = vmax.f32 %v1446_v19, %v2288_v39  ;;  %v2860_v50 = vmax.f32 %v1445_v18, %v2287_v52  ;;  %v2278_v62 = vunpack.i.h.bf16 %v2276_v40 }
 0x16e   : > { %v692_v21 = vadd.f32 %v691_v54, %v559_v3  ;;  %v2277_v3 = vunpack.i.l.bf16 %v2276_v40 }
 0x16f   : > { %v2851_v54 = vadd.f32 %v2593_v24, %v1401_v30  ;;  %v2359_v16 = vpack.i.bf16 %v2856_v42, %v2860_v50  ;;  %v2877_v52 = vmax.f32 %v1442_v9, %v2278_v62 }
 0x170   : > { %v2881_v34 = vmax.f32 %v1441_v8, %v2277_v3 }
 0x172   : > { %v950_v23 = vpop.f32.mrf.mxu2  ;;  %v2349_v8 = vpack.i.bf16 %v2877_v52, %v2881_v34 }
 0x173   : > { %v985_v57 = vadd.f32 %v950_v23, %v692_v21  ;;  %v1367_v53 = vpop.f32.mrf.mxu3 }
 0x174   : > { %v694_v15 = vpop.f32.mrf.mxu1 }
 0x175   : > { %v1402_v38 = vadd.f32 %v1367_v53, %v985_v57  ;;  %2345 = vrot.lane.b32.xlu0 %v2344_v27, %s2429_s20  ;;  %v562_v33 = vpop.f32.mrf.mxu0  ;;  %v1465_v57 = vmax.f32 %v2851_v54, 0.0  ;;  %v2291_v53 = vpop.permute.xlu2 %2290 }
 0x176   : > { %v695_v59 = vadd.f32 %v694_v15, %v562_v33  ;;  %v2293_v9 = vunpack.i.h.bf16 %v2291_v53  ;;  %v2292_v62 = vunpack.i.l.bf16 %v2291_v53 }
 0x177   : > { %v2863_v58 = vadd.f32 %v2593_v24, %v1402_v38 }
 0x178   : > { %v2902_v43 = vmax.f32 %v1448_v0, %v2293_v9  ;;  %v2906_v5 = vmax.f32 %v1447_v63, %v2292_v62  ;;  %v3146_v9 = vmax.f32 %v2790_v11, 0.0  ;;  %v3149_v11 = vmax.f32 %v2813_v20, 0.0 }
 0x179   : > { %v1466_v60 = vmax.f32 %v2863_v58, 0.0 }
 0x17a   : > { %v953_v30 = vpop.f32.mrf.mxu2  ;;  %v2364_v61 = vpack.i.bf16 %v2902_v43, %v2906_v5 }
 0x17b   : > { %v986_v21 = vadd.f32 %v953_v30, %v695_v59  ;;  %v2334_v10 = vpack.i.bf16 %v1466_v60, %v1465_v57  ;;  %v1370_v19 = vpop.f32.mrf.mxu3 }
 0x17c   : > { %v696_v18 = vpop.f32.mrf.mxu1 }
 0x17d   : > { %2360 = vrot.lane.b32.xlu0 %v2359_v16, %s2429_s20  ;;  %2335 = vrot.lane.b32.xlu1 %v2334_v10, %s2428_s19  ;;  %v564_v15 = vpop.f32.mrf.mxu0  ;;  %v1403_v23 = vadd.f32 %v1370_v19, %v986_v21  ;;  %v2282_v19 = vunpack.i.l.bf16 %v2831_v28 }
 0x17e   : > { %v697_v39 = vadd.f32 %v696_v18, %v564_v15  ;;  %v2283_v18 = vunpack.i.h.bf16 %v2831_v28  ;;  %v2296_v28 = vpop.permute.xlu2 %2295 }
 0x17f   : > { %v2301_v27 = vpop.permute.xlu0 %2300  ;;  %v2892_v1 = vadd.f32 %v2593_v24, %v1403_v23  ;;  %v2929_v63 = vmax.f32 %v1443_v46, %v2282_v19  ;;  %v2298_v53 = vunpack.i.h.bf16 %v2296_v28  ;;  %v2297_v44 = vunpack.i.l.bf16 %v2296_v28 }
 0x180   : > { %v2303_v38 = vunpack.i.h.bf16 %v2301_v27  ;;  %v2302_v33 = vunpack.i.l.bf16 %v2301_v27  ;;  %v3150_v28 = vmax.f32 %v2803_v29, 0.0  ;;  %v3153_v29 = vmax.f32 %v2826_v32, 0.0 }
 0x181   : > { %v2947_v46 = vmax.f32 %v1450_v51, %v2298_v53  ;;  %v2951_v31 = vmax.f32 %v1449_v49, %v2297_v44 }
 0x182   : > { %v955_v40 = vpop.f32.mrf.mxu2  ;;  %v2885_v30 = vmax.f32 %v1452_v14, %v2303_v38  ;;  %v2889_v6 = vmax.f32 %v1451_v12, %v2302_v33  ;;  %v1467_v12 = vmax.f32 %v2892_v1, 0.0 }
 0x183   : > { %v987_v59 = vadd.f32 %v955_v40, %v697_v39  ;;  %v1372_v3 = vpop.f32.mrf.mxu3  ;;  %v2369_v38 = vpack.i.bf16 %v2947_v46, %v2951_v31 }
 0x184   : > { %v2374_v21 = vpack.i.bf16 %v2885_v30, %v2889_v6 }
 0x185   : > { %v1404_v16 = vadd.f32 %v1372_v3, %v987_v59  ;;  %2350 = vrot.lane.b32.xlu1 %v2349_v8, %s2429_s20 }
 0x186   : > { %2375 = vrot.lane.b32.xlu0 %v2374_v21, %s2429_s20 }
 0x187   : > { %v2910_v14 = vadd.f32 %v2593_v24, %v1404_v16  ;;  %v2925_v24 = vmax.f32 %v1444_v48, %v2283_v18  ;;  %v2311_v37 = vpop.permute.xlu2 %2310  ;;  %v3148_v16 = vmax.f32 %v2816_v25, 0.0  ;;  %v3151_v25 = vmax.f32 %v2800_v26, 0.0 }
 0x189   : > { %v1468_v10 = vmax.f32 %v2910_v14, 0.0  ;;  %v2354_v48 = vpack.i.bf16 %v2925_v24, %v2929_v63 }
 0x18b   : > { %v2339_v55 = vpack.i.bf16 %v1468_v10, %v1467_v12 }
 0x18d   : > { %2365 = vrot.lane.b32.xlu1 %v2364_v61, %s2429_s20  ;;  %2340 = vrot.lane.b32.xlu2 %v2339_v55, %s2428_s19 }
 0x18f   : > { %v2306_v0 = vpop.permute.xlu1 %2305 }
 0x190   : > { %v2308_v15 = vunpack.i.h.bf16 %v2306_v0  ;;  %v2307_v39 = vunpack.i.l.bf16 %v2306_v0 }
 0x192   : > { %v2933_v23 = vmax.f32 %v1454_v41, %v2308_v15  ;;  %v2937_v27 = vmax.f32 %v1453_v22, %v2307_v39  ;;  %v2313_v22 = vunpack.i.h.bf16 %v2311_v37  ;;  %v2312_v41 = vunpack.i.l.bf16 %v2311_v37 }
 0x194   : > { %v2379_v35 = vpack.i.bf16 %v2933_v23, %v2937_v27  ;;  %v2958_v33 = vmax.f32 %v1456_v17, %v2313_v22  ;;  %v2962_v51 = vmax.f32 %v3145_v45, %v2312_v41 }
 0x195   : > { %2355 = vrot.lane.b32.xlu2 %v2354_v48, %s2429_s20 }
 0x196   : > { %2380 = vrot.lane.b32.xlu1 %v2379_v35, %s2429_s20  ;;  %v2384_v36 = vpack.i.bf16 %v2958_v33, %v2962_v51  ;;  %v3152_v35 = vmax.f32 %v2829_v56, 0.0 }
 0x19d   : > { %2370 = vrot.lane.b32.xlu2 %v2369_v38, %s2429_s20 }
 0x1a5   : > { %2385 = vrot.lane.b32.xlu2 %v2384_v36, %s2429_s20 }
 0x1af   : > { %v2316_v49 = vpop.permute.xlu0 %2315 }
 0x1b0   : > { %v2318_v40 = vunpack.i.h.bf16 %v2316_v49  ;;  %v2317_v59 = vunpack.i.l.bf16 %v2316_v49 }
 0x1b2   : > { %v2969_v62 = vmax.f32 %v3146_v9, %v2318_v40  ;;  %v2973_v17 = vmax.f32 %v3147_v7, %v2317_v59 }
 0x1b4   : > { %v2389_v2 = vpack.i.bf16 %v2969_v62, %v2973_v17 }
 0x1b6   : > { %2390 = vrot.lane.b32.xlu0 %v2389_v2, %s2429_s20 }
 0x1b7   : > { %v2326_v8 = vpop.permute.xlu2 %2325 }
 0x1b8   : > { %v2328_v3 = vunpack.i.h.bf16 %v2326_v8  ;;  %v2327_v21 = vunpack.i.l.bf16 %v2326_v8 }
 0x1ba   : > { %v2980_v18 = vmax.f32 %v3148_v16, %v2328_v3  ;;  %v2984_v19 = vmax.f32 %v3149_v11, %v2327_v21 }
 0x1bc   : > { %v2399_v47 = vpack.i.bf16 %v2980_v18, %v2984_v19 }
 0x1be   : > { %2400 = vrot.lane.b32.xlu2 %v2399_v47, %s2429_s20 }
 0x1bf   : > { %v2321_v61 = vpop.permute.xlu1 %2320 }
 0x1c0   : > { %v2323_v55 = vunpack.i.h.bf16 %v2321_v61  ;;  %v2322_v0 = vunpack.i.l.bf16 %v2321_v61 }
 0x1c2   : > { %v2991_v15 = vmax.f32 %v3150_v28, %v2323_v55  ;;  %v2995_v39 = vmax.f32 %v3151_v25, %v2322_v0 }
 0x1c4   : > { %v2394_v20 = vpack.i.bf16 %v2991_v15, %v2995_v39 }
 0x1c6   : > { %2395 = vrot.lane.b32.xlu1 %v2394_v20, %s2429_s20 }
 0x1df   : > { %v2331_v53 = vpop.permute.xlu0 %2330 }
 0x1e0   : > { %v2333_v44 = vunpack.i.h.bf16 %v2331_v53  ;;  %v2332_v48 = vunpack.i.l.bf16 %v2331_v53 }
 0x1e2   : > { %v3002_v37 = vmax.f32 %v3152_v35, %v2333_v44  ;;  %v3006_v22 = vmax.f32 %v3153_v29, %v2332_v48 }
 0x1e4   : > { %v2404_v26 = vpack.i.bf16 %v3002_v37, %v3006_v22 }
 0x1e6   : > { %2405 = vrot.lane.b32.xlu0 %v2404_v26, %s2429_s20 }
 0x1e7   : > { %v2346_v41 = vpop.permute.xlu0 %2345  ;;  %v2341_v38 = vpop.permute.xlu2 %2340 }
 0x1e8   : > { %v2348_v45 = vunpack.i.h.bf16 %v2346_v41  ;;  %v2347_v36 = vunpack.i.l.bf16 %v2346_v41  ;;  %v2343_v49 = vunpack.i.h.bf16 %v2341_v38  ;;  %v2342_v40 = vunpack.i.l.bf16 %v2341_v38 }
 0x1ea   : > { %v1740_v56 = vmax.f32 %v2842_v4, %v2348_v45  ;;  %v1739_v59 = vmax.f32 %v2846_v13, %v2347_v36  ;;  %v3016_v32 = vmax.f32 %v1468_v10, %v2343_v49  ;;  %v3020_v9 = vmax.f32 %v1467_v12, %v2342_v40 }
 0x1ec   : > { %v1770_v7 = vpack.c.bf16 %v1740_v56, %v1740_v56  ;;  %v1769_v4 = vpack.c.bf16 %v1739_v59, %v1739_v59  ;;  %v2414_v13 = vpack.i.bf16 %v3016_v32, %v3020_v9 }
 0x1ee   : > { %1801 = vst.msk [vmem:[%s3025_s23 + $0x4] sm:$0xf] %vm1799_vm2, %v1770_v7  ;;  %2415 = vrot.lane.b32.xlu2 %v2414_v13, %s2429_s20 }
 0x1ef   : > { %1800 = vst.msk [vmem:[%s3025_s23] sm:$0xf] %vm1799_vm2, %v1769_v4  ;;  %v2361_v1 = vpop.permute.xlu0 %2360  ;;  %v2336_v12 = vpop.permute.xlu1 %2335 }
 0x1f0   : > { %v2363_v14 = vunpack.i.h.bf16 %v2361_v1  ;;  %v2362_v10 = vunpack.i.l.bf16 %v2361_v1  ;;  %v2338_v2 = vunpack.i.h.bf16 %v2336_v12  ;;  %v2337_v8 = vunpack.i.l.bf16 %v2336_v12  ;;  %v2356_v3 = vpop.permute.xlu2 %2355 }
 0x1f1   : > { %v2358_v21 = vunpack.i.h.bf16 %v2356_v3  ;;  %v2357_v16 = vunpack.i.l.bf16 %v2356_v3 }
 0x1f2   : > { %v1746_v11 = vmax.f32 %v2856_v42, %v2363_v14  ;;  %v1745_v47 = vmax.f32 %v2860_v50, %v2362_v10  ;;  %v3038_v61 = vmax.f32 %v1466_v60, %v2338_v2  ;;  %v3042_v55 = vmax.f32 %v1465_v57, %v2337_v8 }
 0x1f3   : > { %v1744_v0 = vmax.f32 %v2925_v24, %v2358_v21  ;;  %v1743_v28 = vmax.f32 %v2929_v63, %v2357_v16 }
 0x1f4   : > { %v1776_v25 = vpack.c.bf16 %v1746_v11, %v1746_v11  ;;  %v1775_v20 = vpack.c.bf16 %v1745_v47, %v1745_v47  ;;  %v2409_v42 = vpack.i.bf16 %v3038_v61, %v3042_v55 }
 0x1f5   : > { %v1774_v53 = vpack.c.bf16 %v1744_v0, %v1744_v0  ;;  %v1773_v50 = vpack.c.bf16 %v1743_v28, %v1743_v28 }
 0x1f6   : > { %1807 = vst.msk [vmem:[%s3025_s23 + $0x1c] sm:$0xf] %vm1799_vm2, %v1776_v25  ;;  %2410 = vrot.lane.b32.xlu1 %v2409_v42, %s2429_s20 }
 0x1f7   : > { %1806 = vst.msk [vmem:[%s3025_s23 + $0x18] sm:$0xf] %vm1799_vm2, %v1775_v20  ;;  %v2351_v54 = vpop.permute.xlu1 %2350 }
 0x1f8   : > { %1805 = vst.msk [vmem:[%s3025_s23 + $0x14] sm:$0xf] %vm1799_vm2, %v1774_v53  ;;  %v2353_v58 = vunpack.i.h.bf16 %v2351_v54  ;;  %v2352_v57 = vunpack.i.l.bf16 %v2351_v54  ;;  %v2371_v60 = vpop.permute.xlu2 %2370  ;;  %v2376_v24 = vpop.permute.xlu0 %2375 }
 0x1f9   : > { %1804 = vst.msk [vmem:[%s3025_s23 + $0x10] sm:$0xf] %vm1799_vm2, %v1773_v50  ;;  %v2373_v63 = vunpack.i.h.bf16 %v2371_v60  ;;  %v2372_v44 = vunpack.i.l.bf16 %v2371_v60  ;;  %v2378_v48 = vunpack.i.h.bf16 %v2376_v24  ;;  %v2377_v35 = vunpack.i.l.bf16 %v2376_v24 }
 0x1fa   : > { %v1742_v29 = vmax.f32 %v2877_v52, %v2353_v58  ;;  %v1741_v26 = vmax.f32 %v2881_v34, %v2352_v57 }
 0x1fb   : > { %v1750_v41 = vmax.f32 %v2947_v46, %v2373_v63  ;;  %v1749_v38 = vmax.f32 %v2951_v31, %v2372_v44  ;;  %v1752_v45 = vmax.f32 %v2885_v30, %v2378_v48  ;;  %v1751_v36 = vmax.f32 %v2889_v6, %v2377_v35 }
 0x1fc   : > { %v1772_v49 = vpack.c.bf16 %v1742_v29, %v1742_v29  ;;  %v1771_v40 = vpack.c.bf16 %v1741_v26, %v1741_v26 }
 0x1fd   : > { %v1780_v56 = vpack.c.bf16 %v1750_v41, %v1750_v41  ;;  %v1779_v59 = vpack.c.bf16 %v1749_v38, %v1749_v38  ;;  %v1782_v52 = vpack.c.bf16 %v1752_v45, %v1752_v45  ;;  %v1781_v34 = vpack.c.bf16 %v1751_v36, %v1751_v36 }
 0x1fe   : > { %1803 = vst.msk [vmem:[%s3025_s23 + $0xc] sm:$0xf] %vm1799_vm2, %v1772_v49 }
 0x1ff   : > { %1802 = vst.msk [vmem:[%s3025_s23 + $0x8] sm:$0xf] %vm1799_vm2, %v1771_v40  ;;  %v2366_v46 = vpop.permute.xlu1 %2365 }
 0x200   : > { %1811 = vst.msk [vmem:[%s3025_s23 + $0x2c] sm:$0xf] %vm1799_vm2, %v1780_v56  ;;  %v2368_v31 = vunpack.i.h.bf16 %v2366_v46  ;;  %v2367_v30 = vunpack.i.l.bf16 %v2366_v46  ;;  %v2386_v6 = vpop.permute.xlu2 %2385 }
 0x201   : > { %1810 = vst.msk [vmem:[%s3025_s23 + $0x28] sm:$0xf] %vm1799_vm2, %v1779_v59  ;;  %v2388_v7 = vunpack.i.h.bf16 %v2386_v6  ;;  %v2387_v4 = vunpack.i.l.bf16 %v2386_v6 }
 0x202   : > { %1813 = vst.msk [vmem:[%s3025_s23 + $0x34] sm:$0xf] %vm1799_vm2, %v1782_v52  ;;  %v1748_v13 = vmax.f32 %v2902_v43, %v2368_v31  ;;  %v1747_v1 = vmax.f32 %v2906_v5, %v2367_v30 }
 0x203   : > { %1812 = vst.msk [vmem:[%s3025_s23 + $0x30] sm:$0xf] %vm1799_vm2, %v1781_v34  ;;  %v1756_v12 = vmax.f32 %v2958_v33, %v2388_v7  ;;  %v1755_v14 = vmax.f32 %v2962_v51, %v2387_v4 }
 0x204   : > { %v1778_v10 = vpack.c.bf16 %v1748_v13, %v1748_v13  ;;  %v1777_v2 = vpack.c.bf16 %v1747_v1, %v1747_v1 }
 0x205   : > { %v1786_v8 = vpack.c.bf16 %v1756_v12, %v1756_v12  ;;  %v1785_v3 = vpack.c.bf16 %v1755_v14, %v1755_v14 }
 0x206   : > { %1809 = vst.msk [vmem:[%s3025_s23 + $0x24] sm:$0xf] %vm1799_vm2, %v1778_v10 }
 0x207   : > { %1808 = vst.msk [vmem:[%s3025_s23 + $0x20] sm:$0xf] %vm1799_vm2, %v1777_v2 }
 0x208   : > { %1817 = vst.msk [vmem:[%s3025_s23 + $0x44] sm:$0xf] %vm1799_vm2, %v1786_v8  ;;  %v2381_v43 = vpop.permute.xlu1 %2380 }
 0x209   : > { %1816 = vst.msk [vmem:[%s3025_s23 + $0x40] sm:$0xf] %vm1799_vm2, %v1785_v3  ;;  %v2383_v5 = vunpack.i.h.bf16 %v2381_v43  ;;  %v2382_v33 = vunpack.i.l.bf16 %v2381_v43 }
 0x20b   : > { %v1754_v51 = vmax.f32 %v2933_v23, %v2383_v5  ;;  %v1753_v21 = vmax.f32 %v2937_v27, %v2382_v33 }
 0x20d   : > { %v1784_v16 = vpack.c.bf16 %v1754_v51, %v1754_v51  ;;  %v1783_v11 = vpack.c.bf16 %v1753_v21, %v1753_v21 }
 0x20f   : > { %1815 = vst.msk [vmem:[%s3025_s23 + $0x3c] sm:$0xf] %vm1799_vm2, %v1784_v16 }
 0x210   : > { %1814 = vst.msk [vmem:[%s3025_s23 + $0x38] sm:$0xf] %vm1799_vm2, %v1783_v11 }
 0x218   : > { %v2401_v47 = vpop.permute.xlu2 %2400 }
 0x219   : > { %v2403_v0 = vunpack.i.h.bf16 %v2401_v47  ;;  %v2402_v28 = vunpack.i.l.bf16 %v2401_v47 }
 0x21b   : > { %v1762_v25 = vmax.f32 %v2980_v18, %v2403_v0  ;;  %v1761_v20 = vmax.f32 %v2984_v19, %v2402_v28 }
 0x21d   : > { %v1792_v42 = vpack.c.bf16 %v1762_v25, %v1762_v25  ;;  %v1791_v53 = vpack.c.bf16 %v1761_v20, %v1761_v20 }
 0x21f   : > { %1823 = vst.msk [vmem:[%s3025_s23 + $0x5c] sm:$0xf] %vm1799_vm2, %v1792_v42 }
 0x220   : > { %1822 = vst.msk [vmem:[%s3025_s23 + $0x58] sm:$0xf] %vm1799_vm2, %v1791_v53 }
 0x228   : > { %v2391_v23 = vpop.permute.xlu0 %2390 }
 0x229   : > { %v2393_v27 = vunpack.i.h.bf16 %v2391_v23  ;;  %v2392_v50 = vunpack.i.l.bf16 %v2391_v23 }
 0x22b   : > { %v1758_v54 = vmax.f32 %v2969_v62, %v2393_v27  ;;  %v1757_v58 = vmax.f32 %v2973_v17, %v2392_v50 }
 0x22d   : > { %v1788_v57 = vpack.c.bf16 %v1758_v54, %v1758_v54  ;;  %v1787_v60 = vpack.c.bf16 %v1757_v58, %v1757_v58 }
 0x22f   : > { %1819 = vst.msk [vmem:[%s3025_s23 + $0x4c] sm:$0xf] %vm1799_vm2, %v1788_v57 }
 0x230   : > { %1818 = vst.msk [vmem:[%s3025_s23 + $0x48] sm:$0xf] %vm1799_vm2, %v1787_v60 }
 0x238   : > { %v2396_v18 = vpop.permute.xlu1 %2395 }
 0x239   : > { %v2398_v19 = vunpack.i.h.bf16 %v2396_v18  ;;  %v2397_v24 = vunpack.i.l.bf16 %v2396_v18 }
 0x23b   : > { %v1760_v63 = vmax.f32 %v2991_v15, %v2398_v19  ;;  %v1759_v44 = vmax.f32 %v2995_v39, %v2397_v24 }
 0x23d   : > { %v1790_v48 = vpack.c.bf16 %v1760_v63, %v1760_v63  ;;  %v1789_v35 = vpack.c.bf16 %v1759_v44, %v1759_v44 }
 0x23f   : > { %1821 = vst.msk [vmem:[%s3025_s23 + $0x54] sm:$0xf] %vm1799_vm2, %v1790_v48 }
 0x240   : > { %1820 = vst.msk [vmem:[%s3025_s23 + $0x50] sm:$0xf] %vm1799_vm2, %v1789_v35 }
 0x248   : > { %v2416_v62 = vpop.permute.xlu2 %2415 }
 0x249   : > { %v2418_v17 = vunpack.i.h.bf16 %v2416_v62  ;;  %v2417_v29 = vunpack.i.l.bf16 %v2416_v62 }
 0x24b   : > { %v1768_v26 = vmax.f32 %v3016_v32, %v2418_v17  ;;  %v1767_v41 = vmax.f32 %v3020_v9, %v2417_v29 }
 0x24d   : > { %v1798_v38 = vpack.c.bf16 %v1768_v26, %v1768_v26  ;;  %v1797_v45 = vpack.c.bf16 %v1767_v41, %v1767_v41 }
 0x24f   : > { %1829 = vst.msk [vmem:[%s3025_s23 + $0x74] sm:$0xf] %vm1799_vm2, %v1798_v38 }
 0x250   : > { %1828 = vst.msk [vmem:[%s3025_s23 + $0x70] sm:$0xf] %vm1799_vm2, %v1797_v45 }
 0x258   : > { %v2406_v15 = vpop.permute.xlu0 %2405 }
 0x259   : > { %v2408_v39 = vunpack.i.h.bf16 %v2406_v15  ;;  %v2407_v36 = vunpack.i.l.bf16 %v2406_v15 }
 0x25b   : > { %v1764_v49 = vmax.f32 %v3002_v37, %v2408_v39  ;;  %v1763_v40 = vmax.f32 %v3006_v22, %v2407_v36 }
 0x25d   : > { %v1794_v56 = vpack.c.bf16 %v1764_v49, %v1764_v49  ;;  %v1793_v59 = vpack.c.bf16 %v1763_v40, %v1763_v40 }
 0x25f   : > { %1825 = vst.msk [vmem:[%s3025_s23 + $0x64] sm:$0xf] %vm1799_vm2, %v1794_v56 }
 0x260   : > { %1824 = vst.msk [vmem:[%s3025_s23 + $0x60] sm:$0xf] %vm1799_vm2, %v1793_v59 }
 0x268   : > { %v2411_v32 = vpop.permute.xlu1 %2410 }
 0x269   : > { %v2413_v9 = vunpack.i.h.bf16 %v2411_v32  ;;  %v2412_v52 = vunpack.i.l.bf16 %v2411_v32 }
 0x26b   : > { %v1766_v34 = vmax.f32 %v3038_v61, %v2413_v9  ;;  %v1765_v46 = vmax.f32 %v3042_v55, %v2412_v52 }
 0x26d   : > { %v1796_v31 = vpack.c.bf16 %v1766_v34, %v1766_v34  ;;  %v1795_v30 = vpack.c.bf16 %v1765_v46, %v1765_v46 }
 0x26f   : > { %1827 = vst.msk [vmem:[%s3025_s23 + $0x6c] sm:$0xf] %vm1799_vm2, %v1796_v31 }
 0x270   : > { %1826 = vst.msk [vmem:[%s3025_s23 + $0x68] sm:$0xf] %vm1799_vm2, %v1795_v30 }
 0x271 PF: > { %s13_s12 = sadd.s32 1, %s2426_s12  }
 0x272   : > { %p10_p4 = scmp.ge.s32.totalorder %s13_s12, 4  }
 0x274   :  { %12 = sbr.rel (!%p10_p4) target bundleno = 1 (0x1), region = 65 }

// kernel: image_embedding_cnn_forward.4
= control target key start
LH: loop header
LB: loop body
LE: loop exit
PB: predicated region body
PF: predicated region fallthrough
CT: control target
= control target key end

     0   :  { %s579_s12 = smov 0   ;;  %s651_s0 = inlined_call_operand.vmem [shape: bf16[2,16,256], index: 0, kind: input, shape index: {}]   ;;  %s652_s1 = inlined_call_operand.vmem [shape: bf16[256,128], index: 1, kind: input, shape index: {}]   ;;  %s653_s2 = inlined_call_operand.vmem [shape: f32[1,128], index: 2, kind: input, shape index: {}]   ;;  %s654_s3 = inlined_call_operand.vmem [shape: bf16[2,16,32], index: 3, kind: output, shape index: {}]  }
   0x1 LB: > { %s425_s13 = sadd.s32 4294967295, %s555_s12   ;;  %p429_p0 = scmp.ge.s32.totalorder %s555_s12, 1  ;;  %s555_s12 = sphi %s579_s12, %s13_s12  }
   0x2   : > { %p137_p1 = scmp.lt.s32.totalorder %s555_s12, 3 }
   0x4   : > { %p138_p2 = pnand %p429_p0, %p137_p1 }
   0x5   : > { %p161_p3 = scmp.lt.s32.totalorder (!%p138_p2), %s425_s13, 1  ;;  %s557_s27 = smov (!%p138_p2), 96  }
   0x6   : > { %141 = sbr.rel (%p138_p2) target bundleno = 429 (0x1ad), region = 32  ;;  %s558_s28 = smov (!%p138_p2), 64  }
   0xb   : > { %v519_v0 = vld [vmem:[%s652_s1 + $0x38] sm:$0xff]  ;;  %v518_v2 = vld [vmem:[%s652_s1 + $0x30] sm:$0xff]  ;;  %v517_v4 = vld [vmem:[%s652_s1 + $0x28] sm:$0xff]  ;;  %s656_s13 = smov (!%p161_p3, %s425_s13), 1  ;;  %vm367_vm0 = vcmask 257024  }
   0xc   : > { %v527_v1 = vld [vmem:[%s652_s1 + $0x78] sm:$0xff]  ;;  %315 = vmatpush.bf16.msra.mxu0 %v519_v0  ;;  %v526_v3 = vld [vmem:[%s652_s1 + $0x70] sm:$0xff]  ;;  %v525_v5 = vld [vmem:[%s652_s1 + $0x68] sm:$0xff]  ;;  %s508_s11 = sshll.u32 %s656_s13, 4  ;;  %s509_s29 = sshll.u32 %s656_s13, 3 }
   0xd   : > { %329 = vmatpush.bf16.msra.mxu1 %v527_v1  ;;  %v516_v6 = vld [vmem:[%s652_s1 + $0x20] sm:$0xff]  ;;  %v515_v8 = vld [vmem:[%s652_s1 + $0x18] sm:$0xff]  ;;  %v514_v10 = vld [vmem:[%s652_s1 + $0x10] sm:$0xff]  ;;  %s165_s20 = scalar_lea.vmem %s651_s0, %s508_s11  ;;  %s170_s5 = scalar_lea.vmem %s654_s3, %s509_s29 }
   0xe   : > { %v524_v7 = vld [vmem:[%s652_s1 + $0x60] sm:$0xff]  ;;  %v523_v9 = vld [vmem:[%s652_s1 + $0x58] sm:$0xff]  ;;  %v522_v11 = vld [vmem:[%s652_s1 + $0x50] sm:$0xff] }
   0xf   : > { %v513_v12 = vld [vmem:[%s652_s1 + $0x8] sm:$0xff]  ;;  %v512_v14 = vld [vmem:[%s652_s1] sm:$0xff] }
  0x10   : > { %316 = vmatpush.bf16.msra.mxu0 %v518_v2  ;;  %v521_v13 = vld [vmem:[%s652_s1 + $0x48] sm:$0xff]  ;;  %v520_v15 = vld [vmem:[%s652_s1 + $0x40] sm:$0xff] }
  0x11   : > { %330 = vmatpush.bf16.msra.mxu1 %v526_v3  ;;  %v436_v16 = vld [vmem:[%s165_s20] sm:$0xf]  ;;  %v511_v17 = vld [vmem:[%s165_s20 + $0x4] sm:$0xf0]  ;;  %v510_v18 = vld [vmem:[%s165_s20 + $0x4] sm:$0xf] }
  0x12   : > { %v438_v19 = vld [vmem:[%s165_s20 + $0x8] sm:$0xf0]  ;;  %v437_v20 = vor.u32 %v511_v17, %v436_v16  ;;  %v548_v24 = vld [vmem:[%s653_s2] ss:$0 sm:$0xff] }
  0x13   : > { %v441_v21 = vor.u32 %v510_v18, %v438_v19 }
  0x14   : > { %317 = vmatpush.bf16.msra.mxu0 %v517_v4 }
  0x15   : > { %331 = vmatpush.bf16.msra.mxu1 %v525_v5 }
  0x18   : > { %318 = vmatpush.bf16.msra.mxu0 %v516_v6 }
  0x19   : > { %332 = vmatpush.bf16.msra.mxu1 %v524_v7 }
  0x1c   : > { %319 = vmatpush.bf16.msra.mxu0 %v515_v8 }
  0x1d   : > { %333 = vmatpush.bf16.msra.mxu1 %v523_v9 }
  0x20   : > { %320 = vmatpush.bf16.msra.mxu0 %v514_v10 }
  0x21   : > { %334 = vmatpush.bf16.msra.mxu1 %v522_v11 }
  0x24   : > { %321 = vmatpush.bf16.msra.mxu0 %v513_v12 }
  0x25   : > { %335 = vmatpush.bf16.msra.mxu1 %v521_v13 }
  0x28   : > { %322 = vmatpush.bf16.msra.mxu0 %v512_v14 }
  0x29   : > { %336 = vmatpush.bf16.msra.mxu1 %v520_v15 }
  0x2b   : > { %323 = vmatmul.bf16.vlgmr.msra.gmra.mxu0 %v437_v20 }
  0x2c   : > { %337 = vmatmul.bf16.vlgmr.msra.gmra.mxu1 %v441_v21 }
  0xa8   : > { %v324_v22 = vpop.f32.mrf.mxu0 }
  0xa9   : > { %v338_v23 = vpop.f32.mrf.mxu1  ;;  %v325_v25 = vadd.f32 %v548_v24, %v324_v22 }
  0xab   : > { %v339_v27 = vadd.f32 %v338_v23, %v325_v25 }
  0xad   : > { %v343_v31 = vmax.f32 %v339_v27, 0.0 }
  0xb0   : > { %v326_v26 = vpop.f32.mrf.mxu0 }
  0xb1   : > { %v327_v28 = vadd.f32 %v548_v24, %v326_v26  ;;  %v340_v29 = vpop.f32.mrf.mxu1 }
  0xb3   : > { %v341_v30 = vadd.f32 %v340_v29, %v327_v28 }
  0xb5   : > { %v344_v32 = vmax.f32 %v341_v30, 0.0 }
  0xb7   : > { %v538_v33 = vpack.i.bf16 %v344_v32, %v343_v31 }
  0xb9   : > { %539 = vrot.lane.b32.xlu0 %v538_v33, %s557_s27 }
 0x12b   : > { %v540_v34 = vpop.permute.xlu0 %539 }
 0x12c   : > { %v542_v35 = vunpack.i.h.bf16 %v540_v34  ;;  %v541_v36 = vunpack.i.l.bf16 %v540_v34 }
 0x12e   : > { %v354_v37 = vmax.f32 %v344_v32, %v542_v35  ;;  %v353_v38 = vmax.f32 %v343_v31, %v541_v36 }
 0x130   : > { %v543_v39 = vpack.i.bf16 %v354_v37, %v353_v38 }
 0x132   : > { %544 = vrot.lane.b32.xlu0 %v543_v39, %s558_s28 }
 0x1a4   : > { %v545_v40 = vpop.permute.xlu0 %544 }
 0x1a5   : > { %v547_v41 = vunpack.i.h.bf16 %v545_v40  ;;  %v546_v42 = vunpack.i.l.bf16 %v545_v40 }
 0x1a7   : > { %v364_v43 = vmax.f32 %v354_v37, %v547_v41  ;;  %v363_v44 = vmax.f32 %v353_v38, %v546_v42 }
 0x1a9   : > { %v366_v45 = vpack.c.bf16 %v364_v43, %v364_v43  ;;  %v365_v46 = vpack.c.bf16 %v363_v44, %v363_v44 }
 0x1ab   : > { %369 = vst.msk [vmem:[%s170_s5 + $0x4] sm:$0xf] %vm367_vm0, %v366_v45 }
 0x1ac   : > { %368 = vst.msk [vmem:[%s170_s5] sm:$0xf] %vm367_vm0, %v365_v46 }
 0x1ad PF: > { %s13_s12 = sadd.s32 1, %s555_s12  }
 0x1ae   : > { %p10_p4 = scmp.ge.s32.totalorder %s13_s12, 4  }
 0x1b0   :  { %12 = sbr.rel (!%p10_p4) target bundleno = 1 (0x1), region = 62 }

// kernel: image_embedding_cnn_forward.5
= control target key start
LH: loop header
LB: loop body
LE: loop exit
PB: predicated region body
PF: predicated region fallthrough
CT: control target
= control target key end

     0   :  { %s1509_s0 = inlined_call_operand.vmem [shape: bf16[2,512], index: 0, kind: input, shape index: {}]   ;;  %s1510_s1 = inlined_call_operand.vmem [shape: bf16[512,512], index: 1, kind: input, shape index: {}]   ;;  %s1511_s2 = inlined_call_operand.vmem [shape: f32[1,512], index: 2, kind: input, shape index: {}]   ;;  %s1512_s3 = inlined_call_operand.hbm [shape: f32[2,512], index: 3, kind: output, shape index: {}]  }
   0x1   :  { %1514 = sst [smem:[#allocation7_spill]] %s1509_s0 }
   0x2   :  { %8 = vsyncpa [#allocation5], 0 }
   0x3   :  { %10 = vsyncpa [#allocation5 + $0x1], 0  ;;  %s1185_s12 = smov 0   ;;  %s1187_s13 = smov 0  }
   0x4   :  { %s1189_s14 = smov 0   ;;  %s1191_s15 = smov 0  }
   0x5   :  { %s1193_s16 = smov 0   ;;  %s1195_s17 = smov 0  }
   0x6   :  { %s1197_s18 = smov 0   ;;  %s1199_s19 = smov 0  }
   0x7   :  { %s1201_s20 = smov 0   ;;  %s1203_s21 = smov 0  }
   0x8 LB: > { %s781_s22 = sadd.s32 4294967295, %s1162_s21   ;;  %s782_s23 = sadd.s32 4294967294, %s1162_s21   ;;  %s1162_s21 = sphi %s1203_s21, %s16_s21   ;;  %s1158_s20 = sphi %s1201_s20, %s1529_s20   ;;  %s1154_s19 = sphi %s1199_s19, %s1528_s19   ;;  %s1150_s18 = sphi %s1197_s18, %s1527_s18   ;;  %s1146_s17 = sphi %s1195_s17, %s1526_s17   ;;  %s1142_s16 = sphi %s1193_s16, %s1525_s16   ;;  %s1138_s15 = sphi %s1191_s15, %s1524_s15   ;;  %s1134_s14 = sphi %s1189_s14, %s1523_s14   ;;  %s1130_s13 = sphi %s1187_s13, %s1522_s13   ;;  %s1126_s12 = sphi %s1185_s12, %s1521_s12  }
   0x9   : > { %s25_s24 = sadd.s32 1, %s1154_s19  ;;  %s28_s25 = sadd.s32 1, %s1158_s20 }
   0xa   : > { %p26_p0 = scmp.ge.s32.totalorder %s25_s24, 2  ;;  %s63_s26 = sadd.s32 1, %s1142_s16 }
   0xb   : > { %p70_p1 = scmp.ne.s32.totalorder %s1142_s16, %s1138_s15  ;;  %p71_p2 = scmp.eq.s32.totalorder %s1162_s21, 0 }
   0xc   : > { %s1531_s24 = smov (%p26_p0, %s25_s24), 0  ;;  %s1533_s25 = smov (!%p26_p0, %s28_s25), %s1158_s20 }
   0xd   : > { %s58_s27 = ssub.s32 %s1154_s19, %s1531_s24  ;;  %p1248_p3 = por %p71_p2, %p70_p1 }
   0xe   : > { %p30_p4 = scmp.ge.s32.totalorder %s1533_s25, 2  ;;  %s115_s29 = sadd.s32 1, %s1134_s14 }
   0xf   : > { %p125_p5 = scmp.ne.s32.totalorder %s1134_s14, %s1130_s13  ;;  %p126_p6 = scmp.eq.s32.totalorder %s781_s22, 3 }
  0x10   : > { %s1535_s25 = smov (%p30_p4, %s1533_s25), 0  ;;  %p131_p8 = scmp.ne.s32.totalorder %s1130_s13, %s1126_s12 }
  0x11   : > { %p1257_p7 = por %p126_p6, %p125_p5  ;;  %s59_s4 = ssub.s32 %s1158_s20, %s1535_s25 }
  0x12   : > { %p132_p9 = scmp.eq.s32.totalorder %s782_s23, 3  ;;  %s60_s5 = sor.u32 %s59_s4, %s58_s27 }
  0x13   : > { %p113_p10 = scmp.eq.s32.totalorder %s59_s4, 0  ;;  %p61_p11 = scmp.eq.s32.totalorder %s60_s5, 0 }
  0x14   : > { %p1265_p12 = por %p132_p9, %p131_p8  ;;  %p784_p13 = scmp.ge.s32.totalorder %s1162_s21, 4 }
  0x15   : > { %s1270_s7 = scalar_select %p113_p10, %s1134_s14, %s115_s29  }
  0x16   : > { %s1273_s8 = scalar_select %p61_p11, %s1142_s16, %s63_s26  }
  0x17   : > { %148 = sbr.rel (%p784_p13) target bundleno = 67 (0x43), region = 16 }
  0x1c   : > { %159 = sbr.rel (!%p1248_p3) target bundleno = 67 (0x43), region = 24  ;;  %s161_s9 = sand.u32 (%p1248_p3), 1, %s1142_s16  }
  0x1d   : > { %s787_s10 = sshll.u32 (%p1248_p3), %s1158_s20, 1  ;;  %s785_s11 = sshll.u32 (%p1248_p3), %s161_s9, 8 }
  0x1e   : > { %s930_s22 = sshll.u32 (%p1248_p3), %s1154_s19, 7  ;;  %s1289_s28 = scalar_lea.vmem (%p1248_p3), [#allocation3], %s785_s11 }
  0x1f   : > { %s167_s23 = sadd.s32 (%p1248_p3), %s930_s22, %s787_s10 }
  0x20   : > { %s789_s27 = sshll.u32 (%p1248_p3), %s167_s23, 2 }
  0x21   : > { %s1284_s26 = scalar_lea.vmem %s1510_s1, %s789_s27 }
  0x22   : > { %v260_v0 = vld [vmem:[%s1284_s26] sm:$0xff]  ;;  %v262_v1 = vld [vmem:[%s1284_s26 + $0x10] sm:$0xff] }
  0x23   : > { %v264_v2 = vld [vmem:[%s1284_s26 + $0x20] sm:$0xff]  ;;  %261 = vst [vmem:[%s1289_s28] sm:$0xff] %v260_v0  ;;  %v266_v3 = vld [vmem:[%s1284_s26 + $0x30] sm:$0xff] }
  0x24   : > { %263 = vst [vmem:[%s1289_s28 + $0x8] sm:$0xff] %v262_v1  ;;  %v268_v4 = vld [vmem:[%s1284_s26 + $0x40] sm:$0xff]  ;;  %v270_v5 = vld [vmem:[%s1284_s26 + $0x50] sm:$0xff] }
  0x25   : > { %265 = vst [vmem:[%s1289_s28 + $0x10] sm:$0xff] %v264_v2  ;;  %v272_v6 = vld [vmem:[%s1284_s26 + $0x60] sm:$0xff]  ;;  %v274_v7 = vld [vmem:[%s1284_s26 + $0x70] sm:$0xff] }
  0x26   : > { %267 = vst [vmem:[%s1289_s28 + $0x18] sm:$0xff] %v266_v3  ;;  %v276_v8 = vld [vmem:[%s1284_s26 + $0x80] sm:$0xff]  ;;  %v278_v9 = vld [vmem:[%s1284_s26 + $0x90] sm:$0xff] }
  0x27   : > { %269 = vst [vmem:[%s1289_s28 + $0x20] sm:$0xff] %v268_v4  ;;  %v280_v10 = vld [vmem:[%s1284_s26 + $0xa0] sm:$0xff]  ;;  %v282_v11 = vld [vmem:[%s1284_s26 + $0xb0] sm:$0xff] }
  0x28   : > { %271 = vst [vmem:[%s1289_s28 + $0x28] sm:$0xff] %v270_v5  ;;  %v284_v12 = vld [vmem:[%s1284_s26 + $0xc0] sm:$0xff]  ;;  %v286_v13 = vld [vmem:[%s1284_s26 + $0xd0] sm:$0xff] }
  0x29   : > { %273 = vst [vmem:[%s1289_s28 + $0x30] sm:$0xff] %v272_v6  ;;  %v288_v14 = vld [vmem:[%s1284_s26 + $0xe0] sm:$0xff]  ;;  %v290_v15 = vld [vmem:[%s1284_s26 + $0xf0] sm:$0xff] }
  0x2a   : > { %275 = vst [vmem:[%s1289_s28 + $0x38] sm:$0xff] %v274_v7  ;;  %v292_v16 = vld [vmem:[%s1284_s26 + $0x100] sm:$0xff]  ;;  %v294_v17 = vld [vmem:[%s1284_s26 + $0x110] sm:$0xff] }
  0x2b   : > { %277 = vst [vmem:[%s1289_s28 + $0x40] sm:$0xff] %v276_v8  ;;  %v296_v18 = vld [vmem:[%s1284_s26 + $0x120] sm:$0xff]  ;;  %v298_v19 = vld [vmem:[%s1284_s26 + $0x130] sm:$0xff] }
  0x2c   : > { %279 = vst [vmem:[%s1289_s28 + $0x48] sm:$0xff] %v278_v9  ;;  %v300_v20 = vld [vmem:[%s1284_s26 + $0x140] sm:$0xff]  ;;  %v302_v21 = vld [vmem:[%s1284_s26 + $0x150] sm:$0xff] }
  0x2d   : > { %281 = vst [vmem:[%s1289_s28 + $0x50] sm:$0xff] %v280_v10  ;;  %v304_v22 = vld [vmem:[%s1284_s26 + $0x160] sm:$0xff]  ;;  %v306_v23 = vld [vmem:[%s1284_s26 + $0x170] sm:$0xff] }
  0x2e   : > { %283 = vst [vmem:[%s1289_s28 + $0x58] sm:$0xff] %v282_v11  ;;  %v308_v24 = vld [vmem:[%s1284_s26 + $0x180] sm:$0xff]  ;;  %v310_v25 = vld [vmem:[%s1284_s26 + $0x190] sm:$0xff] }
  0x2f   : > { %285 = vst [vmem:[%s1289_s28 + $0x60] sm:$0xff] %v284_v12  ;;  %v312_v26 = vld [vmem:[%s1284_s26 + $0x1a0] sm:$0xff]  ;;  %v314_v27 = vld [vmem:[%s1284_s26 + $0x1b0] sm:$0xff] }
  0x30   : > { %287 = vst [vmem:[%s1289_s28 + $0x68] sm:$0xff] %v286_v13  ;;  %v316_v28 = vld [vmem:[%s1284_s26 + $0x1c0] sm:$0xff]  ;;  %v318_v29 = vld [vmem:[%s1284_s26 + $0x1d0] sm:$0xff] }
  0x31   : > { %289 = vst [vmem:[%s1289_s28 + $0x70] sm:$0xff] %v288_v14  ;;  %v320_v30 = vld [vmem:[%s1284_s26 + $0x1e0] sm:$0xff]  ;;  %v322_v31 = vld [vmem:[%s1284_s26 + $0x1f0] sm:$0xff] }
  0x32   : > { %291 = vst [vmem:[%s1289_s28 + $0x78] sm:$0xff] %v290_v15 }
  0x33   : > { %293 = vst [vmem:[%s1289_s28 + $0x80] sm:$0xff] %v292_v16 }
  0x34   : > { %295 = vst [vmem:[%s1289_s28 + $0x88] sm:$0xff] %v294_v17 }
  0x35   : > { %297 = vst [vmem:[%s1289_s28 + $0x90] sm:$0xff] %v296_v18 }
  0x36   : > { %299 = vst [vmem:[%s1289_s28 + $0x98] sm:$0xff] %v298_v19 }
  0x37   : > { %301 = vst [vmem:[%s1289_s28 + $0xa0] sm:$0xff] %v300_v20 }
  0x38   : > { %303 = vst [vmem:[%s1289_s28 + $0xa8] sm:$0xff] %v302_v21 }
  0x39   : > { %305 = vst [vmem:[%s1289_s28 + $0xb0] sm:$0xff] %v304_v22 }
  0x3a   : > { %307 = vst [vmem:[%s1289_s28 + $0xb8] sm:$0xff] %v306_v23 }
  0x3b   : > { %309 = vst [vmem:[%s1289_s28 + $0xc0] sm:$0xff] %v308_v24 }
  0x3c   : > { %311 = vst [vmem:[%s1289_s28 + $0xc8] sm:$0xff] %v310_v25 }
  0x3d   : > { %313 = vst [vmem:[%s1289_s28 + $0xd0] sm:$0xff] %v312_v26 }
  0x3e   : > { %315 = vst [vmem:[%s1289_s28 + $0xd8] sm:$0xff] %v314_v27 }
  0x3f   : > { %317 = vst [vmem:[%s1289_s28 + $0xe0] sm:$0xff] %v316_v28 }
  0x40   : > { %319 = vst [vmem:[%s1289_s28 + $0xe8] sm:$0xff] %v318_v29 }
  0x41   : > { %321 = vst [vmem:[%s1289_s28 + $0xf0] sm:$0xff] %v320_v30 }
  0x42   : > { %323 = vst [vmem:[%s1289_s28 + $0xf8] sm:$0xff] %v322_v31 }
  0x43 PF: > { %p790_p0 = scmp.ge.s32.totalorder %s1162_s21, 1  ;;  %p336_p1 = scmp.lt.s32.totalorder %s1162_s21, 5 }
  0x45   : > { %p337_p2 = pnand %p790_p0, %p336_p1 }
  0x46   : > { %s343_s5 = sand.u32 (!%p337_p2), 1, %s1138_s15   ;;  %s1513_s9 = sand.u32 (!%p337_p2), 1, %s1130_s13  }
  0x47   : > { %340 = sbr.rel (%p337_p2) target bundleno = 289 (0x121), region = 66  ;;  %s791_s10 = sshll.u32 (!%p337_p2), %s343_s5, 8 }
  0x48   : > { %s1358_s11 = sshll.u32 (!%p337_p2), %s1513_s9, 2  ;;  %s793_s22 = sshll.u32 (!%p337_p2), %s1146_s17, 1 }
  0x49   : > { %s794_s23 = sshll.u32 (!%p337_p2), %s1150_s18, 1  ;;  %p375_p3 = scmp.lt.s32.totalorder (!%p337_p2), %s793_s22, 3 }
  0x4a   : > { %p382_p4 = scmp.lt.s32.totalorder (!%p337_p2), %s794_s23, 3  ;;  %s1518_s0 = sld [smem:[#allocation7_spill]] (!%p337_p2) }
  0x4b   : > { %s1374_s5 = scalar_lea.vmem (!%p337_p2), [#allocation3], %s791_s10  ;;  %s373_s9 = scalar_lea.vmem (!%p337_p2), [#allocation4], %s1358_s11 }
  0x4c   : > { %s1537_s22 = smov (!%p375_p3, %s793_s22), 3  ;;  %s1539_s23 = smov (!%p382_p4, %s794_s23), 3 }
  0x4d   : > { %s384_s28 = scalar_lea.vmem %s1511_s2, %s1539_s23  ;;  %p795_p5 = scmp.ne.s32.totalorder %s1146_s17, 0 }
  0x4f   : > { %390 = sbr.rel (%p795_p5) target bundleno = 86 (0x56), region = 74 }
  0x50   : > { %s377_s15 = scalar_lea.vmem %s1518_s0, %s1537_s22 }
  0x54   : > { %v1164_v32 = vmov 0.0  }
  0x55   : > { %391 = vst [vmem:[#allocation2] sm:$0xf] %v1164_v32 }
  0x56 PF: > { %v854_v33 = vld [vmem:[%s1374_s5 + $0x70] sm:$0xf]  ;;  %v946_v34 = vld [vmem:[%s1374_s5 + $0x74] sm:$0xf0]  ;;  %v945_v38 = vld [vmem:[%s1374_s5 + $0x74] sm:$0xf] }
  0x57   : > { %v918_v35 = vld [vmem:[%s1374_s5 + $0xf0] sm:$0xf]  ;;  %v855_v36 = vor.u32 %v946_v34, %v854_v33  ;;  %v962_v37 = vld [vmem:[%s1374_s5 + $0xf4] sm:$0xf0]  ;;  %v856_v39 = vld [vmem:[%s1374_s5 + $0x78] sm:$0xf0] }
  0x58   : > { %v919_v40 = vor.u32 %v962_v37, %v918_v35  ;;  %v859_v41 = vor.u32 %v945_v38, %v856_v39  ;;  %v961_v42 = vld [vmem:[%s1374_s5 + $0xf4] sm:$0xf]  ;;  %v920_v43 = vld [vmem:[%s1374_s5 + $0xf8] sm:$0xf0]  ;;  %v846_v44 = vld [vmem:[%s1374_s5 + $0x60] sm:$0xf] }
  0x59   : > { %592 = vmatpush.bf16.msra.mxu0 %v855_v36  ;;  %v923_v45 = vor.u32 %v961_v42, %v920_v43  ;;  %v944_v46 = vld [vmem:[%s1374_s5 + $0x64] sm:$0xf0]  ;;  %v910_v47 = vld [vmem:[%s1374_s5 + $0xe0] sm:$0xf]  ;;  %v943_v51 = vld [vmem:[%s1374_s5 + $0x64] sm:$0xf] }
  0x5a   : > { %v960_v48 = vld [vmem:[%s1374_s5 + $0xe4] sm:$0xf0]  ;;  %605 = vmatpush.bf16.msra.mxu1 %v919_v40  ;;  %618 = vmatpush.bf16.msra.mxu2 %v859_v41  ;;  %v847_v49 = vor.u32 %v944_v46, %v846_v44  ;;  %v848_v52 = vld [vmem:[%s1374_s5 + $0x68] sm:$0xf0]  ;;  %v959_v53 = vld [vmem:[%s1374_s5 + $0xe4] sm:$0xf] }
  0x5b   : > { %v911_v50 = vor.u32 %v960_v48, %v910_v47  ;;  %631 = vmatpush.bf16.msra.mxu3 %v923_v45  ;;  %v851_v54 = vor.u32 %v943_v51, %v848_v52  ;;  %v912_v55 = vld [vmem:[%s1374_s5 + $0xe8] sm:$0xf0]  ;;  %v838_v56 = vld [vmem:[%s1374_s5 + $0x50] sm:$0xf]  ;;  %v942_v57 = vld [vmem:[%s1374_s5 + $0x54] sm:$0xf0] }
  0x5c   : > { %v915_v58 = vor.u32 %v959_v53, %v912_v55  ;;  %v902_v59 = vld [vmem:[%s1374_s5 + $0xd0] sm:$0xf]  ;;  %v958_v60 = vld [vmem:[%s1374_s5 + $0xd4] sm:$0xf0]  ;;  %v941_v61 = vld [vmem:[%s1374_s5 + $0x54] sm:$0xf]  ;;  %v839_v62 = vor.u32 %v942_v57, %v838_v56 }
  0x5d   : > { %593 = vmatpush.bf16.msra.mxu0 %v847_v49  ;;  %v840_v63 = vld [vmem:[%s1374_s5 + $0x58] sm:$0xf0]  ;;  %v957_v0 = vld [vmem:[%s1374_s5 + $0xd4] sm:$0xf]  ;;  %v903_v2 = vor.u32 %v958_v60, %v902_v59  ;;  %v830_v4 = vld [vmem:[%s1374_s5 + $0x40] sm:$0xf] }
  0x5e   : > { %v904_v1 = vld [vmem:[%s1374_s5 + $0xd8] sm:$0xf0]  ;;  %606 = vmatpush.bf16.msra.mxu1 %v911_v50  ;;  %619 = vmatpush.bf16.msra.mxu2 %v851_v54  ;;  %v843_v3 = vor.u32 %v941_v61, %v840_v63  ;;  %v940_v5 = vld [vmem:[%s1374_s5 + $0x44] sm:$0xf0]  ;;  %v894_v6 = vld [vmem:[%s1374_s5 + $0xc0] sm:$0xf] }
  0x5f   : > { %632 = vmatpush.bf16.msra.mxu3 %v915_v58  ;;  %v907_v7 = vor.u32 %v957_v0, %v904_v1  ;;  %v956_v8 = vld [vmem:[%s1374_s5 + $0xc4] sm:$0xf0]  ;;  %v939_v9 = vld [vmem:[%s1374_s5 + $0x44] sm:$0xf]  ;;  %v832_v10 = vld [vmem:[%s1374_s5 + $0x48] sm:$0xf0]  ;;  %v831_v13 = vor.u32 %v940_v5, %v830_v4 }
  0x60   : > { %v955_v11 = vld [vmem:[%s1374_s5 + $0xc4] sm:$0xf]  ;;  %v896_v12 = vld [vmem:[%s1374_s5 + $0xc8] sm:$0xf0]  ;;  %v895_v14 = vor.u32 %v956_v8, %v894_v6  ;;  %v835_v15 = vor.u32 %v939_v9, %v832_v10  ;;  %v822_v16 = vld [vmem:[%s1374_s5 + $0x30] sm:$0xf] }
  0x61   : > { %594 = vmatpush.bf16.msra.mxu0 %v839_v62  ;;  %v938_v17 = vld [vmem:[%s1374_s5 + $0x34] sm:$0xf0]  ;;  %v886_v18 = vld [vmem:[%s1374_s5 + $0xb0] sm:$0xf]  ;;  %v899_v19 = vor.u32 %v955_v11, %v896_v12  ;;  %v937_v21 = vld [vmem:[%s1374_s5 + $0x34] sm:$0xf] }
  0x62   : > { %607 = vmatpush.bf16.msra.mxu1 %v903_v2  ;;  %620 = vmatpush.bf16.msra.mxu2 %v843_v3  ;;  %v954_v20 = vld [vmem:[%s1374_s5 + $0xb4] sm:$0xf0]  ;;  %v824_v22 = vld [vmem:[%s1374_s5 + $0x38] sm:$0xf0]  ;;  %v953_v23 = vld [vmem:[%s1374_s5 + $0xb4] sm:$0xf]  ;;  %v823_v25 = vor.u32 %v938_v17, %v822_v16 }
  0x63   : > { %633 = vmatpush.bf16.msra.mxu3 %v907_v7  ;;  %v888_v24 = vld [vmem:[%s1374_s5 + $0xb8] sm:$0xf0]  ;;  %v887_v26 = vor.u32 %v954_v20, %v886_v18  ;;  %v827_v27 = vor.u32 %v937_v21, %v824_v22  ;;  %v814_v28 = vld [vmem:[%s1374_s5 + $0x20] sm:$0xf]  ;;  %v936_v29 = vld [vmem:[%s1374_s5 + $0x24] sm:$0xf0] }
  0x64   : > { %v878_v30 = vld [vmem:[%s1374_s5 + $0xa0] sm:$0xf]  ;;  %v891_v31 = vor.u32 %v953_v23, %v888_v24  ;;  %v952_v32 = vld [vmem:[%s1374_s5 + $0xa4] sm:$0xf0]  ;;  %v935_v33 = vld [vmem:[%s1374_s5 + $0x24] sm:$0xf]  ;;  %v815_v37 = vor.u32 %v936_v29, %v814_v28 }
  0x65   : > { %595 = vmatpush.bf16.msra.mxu0 %v831_v13  ;;  %v816_v34 = vld [vmem:[%s1374_s5 + $0x28] sm:$0xf0]  ;;  %v951_v35 = vld [vmem:[%s1374_s5 + $0xa4] sm:$0xf]  ;;  %v806_v38 = vld [vmem:[%s1374_s5 + $0x10] sm:$0xf]  ;;  %v879_v39 = vor.u32 %v952_v32, %v878_v30 }
  0x66   : > { %608 = vmatpush.bf16.msra.mxu1 %v895_v14  ;;  %621 = vmatpush.bf16.msra.mxu2 %v835_v15  ;;  %v880_v36 = vld [vmem:[%s1374_s5 + $0xa8] sm:$0xf0]  ;;  %v819_v40 = vor.u32 %v935_v33, %v816_v34  ;;  %v934_v41 = vld [vmem:[%s1374_s5 + $0x14] sm:$0xf0]  ;;  %v870_v42 = vld [vmem:[%s1374_s5 + $0x90] sm:$0xf] }
  0x67   : > { %634 = vmatpush.bf16.msra.mxu3 %v899_v19  ;;  %v950_v43 = vld [vmem:[%s1374_s5 + $0x94] sm:$0xf0]  ;;  %v883_v44 = vor.u32 %v951_v35, %v880_v36  ;;  %v933_v45 = vld [vmem:[%s1374_s5 + $0x14] sm:$0xf]  ;;  %v808_v46 = vld [vmem:[%s1374_s5 + $0x18] sm:$0xf0]  ;;  %v807_v50 = vor.u32 %v934_v41, %v806_v38 }
  0x68   : > { %v393_v47 = vld [vmem:[%s377_s15] sm:$0x3]  ;;  %v872_v49 = vld [vmem:[%s1374_s5 + $0x98] sm:$0xf0]  ;;  %v871_v51 = vor.u32 %v950_v43, %v870_v42  ;;  %v811_v52 = vor.u32 %v933_v45, %v808_v46  ;;  %v798_v53 = vld [vmem:[%s1374_s5] sm:$0xf] }
  0x69   : > { %596 = vmatpush.bf16.msra.mxu0 %v823_v25  ;;  %v949_v48 = vld [vmem:[%s1374_s5 + $0x94] sm:$0xf]  ;;  %427 = vst [vmem:[#allocation1] ss:$9 sm:$0xff] %v393_v47  ;;  %v932_v54 = vld [vmem:[%s1374_s5 + $0x4] sm:$0xf0] }
  0x6a   : > { %609 = vmatpush.bf16.msra.mxu1 %v887_v26  ;;  %622 = vmatpush.bf16.msra.mxu2 %v827_v27  ;;  %v862_v55 = vld [vmem:[%s1374_s5 + $0x80] sm:$0xf]  ;;  %v875_v56 = vor.u32 %v949_v48, %v872_v49  ;;  %v948_v57 = vld [vmem:[%s1374_s5 + $0x84] sm:$0xf0]  ;;  %v931_v58 = vld [vmem:[%s1374_s5 + $0x4] sm:$0xf]  ;;  %v799_v62 = vor.u32 %v932_v54, %v798_v53 }
  0x6b   : > { %635 = vmatpush.bf16.msra.mxu3 %v891_v31  ;;  %v800_v59 = vld [vmem:[%s1374_s5 + $0x8] sm:$0xf0]  ;;  %v947_v60 = vld [vmem:[%s1374_s5 + $0x84] sm:$0xf]  ;;  %v863_v63 = vor.u32 %v948_v57, %v862_v55  ;;  %vm647_vm0 = vcmask 1041408   ;;  %p924_p6 = scmp.ne.s32.totalorder %s1146_s17, 1 }
  0x6c   : > { %v864_v61 = vld [vmem:[%s1374_s5 + $0x88] sm:$0xf0]  ;;  %v803_v0 = vor.u32 %v931_v58, %v800_v59  ;;  %v392_v12 = vld [vmem:[#allocation2] sm:$0xf] }
  0x6d   : > { %597 = vmatpush.bf16.msra.mxu0 %v815_v37  ;;  %v867_v1 = vor.u32 %v947_v60, %v864_v61 }
  0x6e   : > { %610 = vmatpush.bf16.msra.mxu1 %v879_v39  ;;  %623 = vmatpush.bf16.msra.mxu2 %v819_v40 }
  0x6f   : > { %636 = vmatpush.bf16.msra.mxu3 %v883_v44 }
  0x70   : > { %v428_v2 = vld [vmem:[#allocation1] sm:$0xff]  ;;  %v429_v3 = vld [vmem:[#allocation1 + $0x9] sm:$0xff] }
  0x71   : > { %598 = vmatpush.bf16.msra.mxu0 %v807_v50 }
  0x72   : > { %611 = vmatpush.bf16.msra.mxu1 %v871_v51  ;;  %624 = vmatpush.bf16.msra.mxu2 %v811_v52 }
  0x73   : > { %637 = vmatpush.bf16.msra.mxu3 %v875_v56 }
  0x75   : > { %599 = vmatpush.bf16.msra.mxu0 %v799_v62 }
  0x76   : > { %612 = vmatpush.bf16.msra.mxu1 %v863_v63  ;;  %625 = vmatpush.bf16.msra.mxu2 %v803_v0 }
  0x77   : > { %638 = vmatpush.bf16.msra.mxu3 %v867_v1 }
  0x78   : > { %600 = vmatmul.bf16.vlgmr.msra.gmra.mxu0 %v428_v2 }
  0x79   : > { %613 = vmatmul.bf16.vlgmr.msra.gmra.mxu1 %v429_v3  ;;  %626 = vmatmul.bf16.vlgmr.msra.gmra.mxu2 %v428_v2 }
  0x7a   : > { %639 = vmatmul.bf16.vlgmr.msra.gmra.mxu3 %v429_v3 }
  0xf5   : > { %v601_v4 = vpop.f32.mrf.mxu0 }
  0xf6   : > { %v614_v5 = vpop.f32.mrf.mxu1 }
  0xf7   : > { %v615_v11 = vadd.f32 %v614_v5, %v601_v4 }
  0xfc   : > { %v627_v6 = vpop.f32.mrf.mxu2 }
  0xfd   : > { %v640_v7 = vpop.f32.mrf.mxu3  ;;  %v603_v8 = vpop.f32.mrf.mxu0 }
  0xfe   : > { %v641_v9 = vadd.f32 %v640_v7, %v627_v6  ;;  %v616_v10 = vpop.f32.mrf.mxu1 }
 0x100   : > { %v646_v13 = vrot.slane %v641_v9, 6 }
 0x101   : > { %655 = sbr.rel (%p924_p6) target bundleno = 274 (0x112), region = 78 }
 0x102   : > { %v648_v14 = vsel %vm647_vm0, %v615_v11, %v646_v13 }
 0x103   : > { %v650_v15 = vadd.f32 %v648_v14, %v392_v12 }
 0x104   : > { %v629_v16 = vpop.f32.mrf.mxu2 }
 0x105   : > { %651 = vst [vmem:[#allocation2] sm:$0xf] %v650_v15  ;;  %v642_v17 = vpop.f32.mrf.mxu3 }
 0x106   : > { %v657_v18 = vld [vmem:[%s384_s28] sm:$0x3] }
 0x107   : > { %v659_v19 = vperm.slane %v657_v18, 0  ;;  %v660_v20 = vperm.slane %v657_v18, 1 }
 0x109   : > { %v661_v22 = vrot.slane %v660_v20, 6 }
 0x10b   : > { %v662_v23 = vsel %vm647_vm0, %v659_v19, %v661_v22 }
 0x10c   : > { %v656_v21 = vld [vmem:[#allocation2] sm:$0xf] }
 0x10d   : > { %v664_v24 = vadd.f32 %v662_v23, %v656_v21 }
 0x10f   : > { %v665_v25 = vmax.f32 %v664_v24, 0.0 }
 0x111   : > { %666 = vst [vmem:[%s373_s9] sm:$0xf] %v665_v25 }
 0x112 PF: > { %s963_s17 = sshll.u32 %s1150_s18, 2  ;;  %s681_s26 = sshll.u32 %s373_s9, 4  ;;  %s682_s26 = int_to_ptr.vmem [resolvable:$true] %s681_s26 }
 0x113   : > { %s679_s29 = scalar_lea.hbm %s1512_s3, %s963_s17  ;;  %s1520_s5 = sand.u32 1, %s1130_s13  }
 0x114   : > { %s683_s28 = sshll.u32 %s679_s29, 4  ;;  %s668_s10 = scalar_lea.sflag [#allocation5], %s1520_s5  ;;  %s684_s28 = int_to_ptr.hbm [resolvable:$true] %s683_s28 }
 0x115   : > { %s1066_s27 = sshra.s32 %s684_s28, 4  ;;  %s1072_s0 = scalar_lea.hbm %s1512_s3, 8  ;;  %s1067_s27 = int_to_ptr.hbm [resolvable:$true] %s1066_s27 }
 0x116   : > { %s1068_s22 = scalar_lea.hbm %s1067_s27, 4  ;;  %p1073_p11 = scmp.lt.s32.totalorder %s1067_s27, %s1512_s3 }
 0x117   : > { %p1069_p8 = scmp.ne.s32.totalorder %s1067_s27, %s1068_s22  ;;  %p1074_p13 = scmp.lt.s32.totalorder %s1072_s0, %s1068_s22 }
 0x119   : > { %p1070_p9 = pnand %p1069_p8, %p1257_p7  ;;  %p1075_p0 = por %p1074_p13, %p1073_p11 }
 0x11b   : > { %p1071_p10 = pneg %p1070_p9 }
 0x11d   : > { %p1076_p1 = pnand %p1075_p0, %p1071_p10 }
 0x11f   : > { %1079 = shalt.err (!%p1076_p1)
}
 0x120   : > { %964 = dma.vmem_to_hbm [thread:$0]  (%p1257_p7), %s682_s26, 64, %s684_s28, %s668_s10  }
 0x121 PF: > { %p970_p2 = scmp.ge.s32.totalorder %s1162_s21, 2  ;;  %s695_s9 = sand.u32 1, %s1126_s12  }
 0x122   : > { %s696_s11 = scalar_lea.sflag [#allocation5], %s695_s9 }
 0x123   : > { %p967_p3 = pnand %p970_p2, %p1265_p12 }
 0x125   : > { %p968_p4 = pneg %p967_p3 }
 0x127   : > { %1121 = dma.done.wait (%p968_p4), %s696_s11, 64  }
 0x128   : > { %1123 = vsyncadd (%p968_p4), %s696_s11, 4294967232  ;;  %s16_s21 = sadd.s32 1, %s1162_s21   ;;  %s1521_s12 = smov %s1130_s13 }
 0x129   : > { %p13_p5 = scmp.ge.s32.totalorder %s16_s21, 6   ;;  %s1522_s13 = smov %s1134_s14 }
 0x12a   : > { %s1523_s14 = smov %s1270_s7  ;;  %s1524_s15 = smov %s1142_s16 }
 0x12b   : > { %s1525_s16 = smov %s1273_s8  ;;  %s1526_s17 = smov %s1154_s19 }
 0x12c   : > { %s1527_s18 = smov %s1158_s20  ;;  %s1528_s19 = smov %s1531_s24 }
 0x12d   : > { %s1529_s20 = smov %s1535_s25  ;;  %15 = sbr.rel (!%p13_p5) target bundleno = 8 (0x8), region = 124 }
 0x132   :  { %702 = vsyncpa [#allocation5], 1 }
 0x133   :  { %704 = vsyncpa [#allocation5 + $0x1], 1 }

</bundles_post_ra>
